<compile_context>
chip_gen: v7x
topology: tpu7x:2x2x1
jax: 0.10.0
libtpu: 0.0.40
codegen_flags: <defaults>
</compile_context>

<pallas_src>
import functools

import jax
import jax.numpy as jnp
import numpy as np
from jax import lax
from jax.experimental import pallas as pl
from jax.experimental.pallas import tpu as pltpu

# bf16 MXU operands on all generations; f32 accumulation / f32 recurrent state.
MATMUL_DTYPE = jnp.bfloat16


def lstm_kernel(x_ref, wih_ref, whh_ref, b_ref, wfc_ref, bfc_ref, out_ref,
                xproj_ref, *, seq_len, matmul_dtype):
    TB, _ = x_ref.shape
    B = TB // seq_len
    H = whh_ref.shape[0]

    # --- Hoisted input projection: one MXU matmul for all timesteps, bias folded.
    # Operands already arrive in matmul_dtype (cast in the wrapper); accumulate f32.
    xproj_ref[...] = (
        jnp.dot(x_ref[...], wih_ref[...], preferred_element_type=jnp.float32)
        + b_ref[...])                                      # (T*B, 4H) f32

    def step(t, carry):
        h, c = carry                                       # (B, H) f32 each
        row0 = pl.multiple_of(t * B, 8)                    # sublane-aligned start
        # Serial critical path: only h @ W_hh per step; W_hh streamed from VMEM.
        gates = (xproj_ref[pl.ds(row0, B), :]              # (B, 4H) precomputed x-part
                 + jnp.dot(h.astype(matmul_dtype), whh_ref[...],
                           preferred_element_type=jnp.float32))
        # PyTorch-native gate order (i, f, g, o): g's tanh can start as soon as
        # its columns drain from the MXU result FIFO; o drains last but isn't
        # needed until after tanh(c_new).
        i_f = jax.nn.sigmoid(gates[:, :2 * H])
        g = jnp.tanh(gates[:, 2 * H:3 * H])
        o = jax.nn.sigmoid(gates[:, 3 * H:])
        c_new = i_f[:, H:2 * H] * c + i_f[:, :H] * g
        h_new = o * jnp.tanh(c_new)
        return h_new, c_new

    h0 = jnp.zeros((B, H), jnp.float32)
    c0 = jnp.zeros((B, H), jnp.float32)
    # T is small & static -> fully unroll so the scheduler overlaps steps.
    h_last, _ = lax.fori_loop(0, seq_len, step, (h0, c0), unroll=True)

    # Classifier head on the last hidden state (lane-dense padded output).
    out_ref[...] = (
        jnp.dot(h_last.astype(matmul_dtype), wfc_ref[...],
                preferred_element_type=jnp.float32)
        + bfc_ref[...])                                    # (B, C_pad) f32


def lstm_forward(x_btI, w_ih, w_hh, b_ih, b_hh, w_fc, b_fc,
                 *, matmul_dtype=MATMUL_DTYPE):
    """x_btI: (B, T, I) float32. Weights in PyTorch layout. Returns (B, C) logits."""
    B, T, I = x_btI.shape
    H = w_hh.shape[1]          # w_hh PyTorch-style: (4H, H)
    C = w_fc.shape[0]          # w_fc PyTorch-style: (C, H)

    # Pad batch to a full sublane and classifier width to a full lane.
    B_pad = max(8, ((B + 7) // 8) * 8)
    C_pad = max(128, ((C + 127) // 128) * 128)

    # ---- Layout prep in plain JAX (glue, runs once) ----
    # x is time-major flattened and pre-cast to the MXU operand dtype.
    x_tbI = jnp.transpose(x_btI, (1, 0, 2)).astype(matmul_dtype)  # (T, B, I)
    if B_pad != B:
        x_tbI = jnp.pad(x_tbI, ((0, 0), (0, B_pad - B), (0, 0)))
    x_flat = x_tbI.reshape(T * B_pad, I)                          # time-major, flat

    # Gate columns stay in PyTorch-native (i, f, g, o) order — no reordering.
    # All matmul weights pre-cast to matmul_dtype; biases stay f32 (added to the
    # f32 accumulator).
    wih_t = jnp.transpose(w_ih).astype(matmul_dtype)              # (I, 4H)
    whh_t = jnp.transpose(w_hh).astype(matmul_dtype)              # (H, 4H)
    b = (b_ih + b_hh).reshape(1, 4 * H).astype(jnp.float32)       # (1, 4H)

    wfc_t = jnp.transpose(w_fc).astype(matmul_dtype)              # (H, C)
    bfc = b_fc.reshape(1, C).astype(jnp.float32)
    if C_pad != C:
        wfc_t = jnp.pad(wfc_t, ((0, 0), (0, C_pad - C)))
        bfc = jnp.pad(bfc, ((0, 0), (0, C_pad - C)))

    vmem = pl.BlockSpec(memory_space=pltpu.MemorySpace.VMEM)
    kernel = functools.partial(lstm_kernel, seq_len=T, matmul_dtype=matmul_dtype)

    # Advisory cost hint for XLA's scheduler around this latency-bound call.
    flops = (2 * T * B_pad * I * 4 * H          # hoisted input projection
             + 2 * T * B_pad * H * 4 * H        # recurrent h @ W_hh chain
             + 2 * B_pad * H * C_pad)           # classifier head
    transcendentals = T * B_pad * 5 * H         # 3 sigmoids + 2 tanh per step
    elt = jnp.dtype(matmul_dtype).itemsize
    bytes_accessed = (x_flat.size * elt + wih_t.size * elt + whh_t.size * elt
                      + wfc_t.size * elt + (b.size + bfc.size) * 4
                      + B_pad * C_pad * 4)
    cost = pl.CostEstimate(flops=flops, transcendentals=transcendentals,
                           bytes_accessed=bytes_accessed)

    out_pad = pl.pallas_call(
        kernel,
        out_shape=jax.ShapeDtypeStruct((B_pad, C_pad), jnp.float32),
        in_specs=[vmem] * 6,
        out_specs=vmem,
        scratch_shapes=[pltpu.VMEM((T * B_pad, 4 * H), jnp.float32)],
        cost_estimate=cost,
    )(x_flat, wih_t, whh_t, b, wfc_t, bfc)

    return out_pad[:B, :C]


def lstm_reference(x_btI, w_ih, w_hh, b_ih, b_hh, w_fc, b_fc):
    """Pure-JAX reference matching torch.nn.LSTM(batch_first=True) + Linear."""
    B, T, I = x_btI.shape
    H = w_hh.shape[1]
    h = jnp.zeros((B, H), jnp.float32)
    c = jnp.zeros((B, H), jnp.float32)
    for t in range(T):
        gates = x_btI[:, t, :] @ w_ih.T + b_ih + h @ w_hh.T + b_hh
        i = jax.nn.sigmoid(gates[:, 0 * H:1 * H])
        f = jax.nn.sigmoid(gates[:, 1 * H:2 * H])
        g = jnp.tanh(gates[:, 2 * H:3 * H])
        o = jax.nn.sigmoid(gates[:, 3 * H:4 * H])
        c = f * c + i * g
        h = o * jnp.tanh(c)
    return h @ w_fc.T + b_fc


if __name__ == "__main__":
    # Shapes consistent with the module: input_size=28, hidden=128, num_layers=1,
    # num_classes=10; batch=2, seq=8.
    B, T, I, H, C = 2, 8, 28, 128, 10

    key = jax.random.PRNGKey(0)
    ks = jax.random.split(key, 7)
    s = 1.0 / np.sqrt(H)   # PyTorch-style uniform(-1/sqrt(H), 1/sqrt(H)) init
    x = jax.random.normal(ks[0], (B, T, I), jnp.float32)
    w_ih = jax.random.uniform(ks[1], (4 * H, I), jnp.float32, -s, s)
    w_hh = jax.random.uniform(ks[2], (4 * H, H), jnp.float32, -s, s)
    b_ih = jax.random.uniform(ks[3], (4 * H,), jnp.float32, -s, s)
    b_hh = jax.random.uniform(ks[4], (4 * H,), jnp.float32, -s, s)
    w_fc = jax.random.uniform(ks[5], (C, H), jnp.float32, -s, s)
    b_fc = jax.random.uniform(ks[6], (C,), jnp.float32, -s, s)

    ref = lstm_reference(x, w_ih, w_hh, b_ih, b_hh, w_fc, b_fc)

    # Tight correctness check with f32 MXU operands.
    out_f32 = lstm_forward(x, w_ih, w_hh, b_ih, b_hh, w_fc, b_fc,
                           matmul_dtype=jnp.float32)
    out_f32 = jax.block_until_ready(out_f32)
    np.testing.assert_allclose(np.asarray(out_f32), np.asarray(ref),
                               rtol=1e-5, atol=1e-5)

    # Fast default path: bf16 MXU operands, f32 accumulation / state.
    out_bf16 = lstm_forward(x, w_ih, w_hh, b_ih, b_hh, w_fc, b_fc)
    out_bf16 = jax.block_until_ready(out_bf16)
    np.testing.assert_allclose(np.asarray(out_bf16), np.asarray(ref),
                               rtol=2e-2, atol=3e-2)

    print("KERNEL_OK")
</pallas_src>

<mosaic_0001>
module attributes {stable_mosaic.version = 11 : i64} {
  func.func @lstm_kernel(%arg0: memref<64x28xf32, #tpu.memory_space<vmem>>, %arg1: memref<28x512xf32, #tpu.memory_space<vmem>>, %arg2: memref<128x512xf32, #tpu.memory_space<vmem>>, %arg3: memref<1x512xf32, #tpu.memory_space<vmem>>, %arg4: memref<128x128xf32, #tpu.memory_space<vmem>>, %arg5: memref<1x128xf32, #tpu.memory_space<vmem>>, %arg6: memref<8x128xf32, #tpu.memory_space<vmem>>, %arg7: memref<64x512xf32, #tpu.memory_space<vmem>>) attributes {dimension_semantics = [], scalar_prefetch = 0 : i64, scratch_operands = 1 : i64, tpu.core_type = #tpu.core_type<tc>} {
    %c0 = arith.constant 0 : index
    %c0_0 = arith.constant 0 : index
    %0 = vector.load %arg0[%c0, %c0_0] : memref<64x28xf32, #tpu.memory_space<vmem>>, vector<64x28xf32>
    %c0_1 = arith.constant 0 : index
    %c0_2 = arith.constant 0 : index
    %1 = vector.load %arg1[%c0_1, %c0_2] : memref<28x512xf32, #tpu.memory_space<vmem>>, vector<28x512xf32>
    %cst = arith.constant dense<0.000000e+00> : vector<64x512xf32>
    %2 = tpu.matmul %0, %1, %cst {dimension_numbers = #tpu.dot_dimension_numbers<[1], [0], [0], [1], [0, 0, 1, 1], [], []>} : vector<64x28xf32>, vector<28x512xf32>, vector<64x512xf32> -> vector<64x512xf32>
    %c0_3 = arith.constant 0 : index
    %c0_4 = arith.constant 0 : index
    %3 = vector.load %arg3[%c0_3, %c0_4] : memref<1x512xf32, #tpu.memory_space<vmem>>, vector<1x512xf32>
    %4 = vector.broadcast %3 : vector<1x512xf32> to vector<64x512xf32>
    %5 = arith.addf %2, %4 : vector<64x512xf32>
    %c0_5 = arith.constant 0 : index
    %c0_6 = arith.constant 0 : index
    %6 = vector.load %arg7[%c0_5, %c0_6] : memref<64x512xf32, #tpu.memory_space<vmem>>, vector<64x512xf32>
    tpu.vector_store %arg7[%c0_5, %c0_6], %5 {strides = array<i32>} : memref<64x512xf32, #tpu.memory_space<vmem>>, vector<64x512xf32>,
    %cst_7 = arith.constant 0.000000e+00 : f32
    %7 = vector.broadcast %cst_7 : f32 to vector<8x128xf32>
    %cst_8 = arith.constant 0.000000e+00 : f32
    %8 = vector.broadcast %cst_8 : f32 to vector<8x128xf32>
    %c0_i32 = arith.constant 0 : i32
    %c8_i32 = arith.constant 8 : i32
    %9 = arith.muli %c0_i32, %c8_i32 : i32
    %10 = tpu.assume_multiple %9, 8 : i32
    %11 = arith.index_cast %10 : i32 to index
    %c0_9 = arith.constant 0 : index
    %12 = vector.load %arg7[%11, %c0_9] : memref<64x512xf32, #tpu.memory_space<vmem>>, vector<8x512xf32>
    %c0_10 = arith.constant 0 : index
    %c0_11 = arith.constant 0 : index
    %13 = vector.load %arg2[%c0_10, %c0_11] : memref<128x512xf32, #tpu.memory_space<vmem>>, vector<128x512xf32>
    %cst_12 = arith.constant dense<0.000000e+00> : vector<8x512xf32>
    %14 = tpu.matmul %7, %13, %cst_12 {dimension_numbers = #tpu.dot_dimension_numbers<[1], [0], [0], [1], [0, 0, 1, 1], [], []>} : vector<8x128xf32>, vector<128x512xf32>, vector<8x512xf32> -> vector<8x512xf32>
    %15 = arith.addf %12, %14 : vector<8x512xf32>
    %16 = vector.extract_strided_slice %15 {offsets = [0, 0], sizes = [8, 256], strides = [1, 1]} : vector<8x512xf32> to vector<8x256xf32>
    %17 = arith.negf %16 : vector<8x256xf32>
    %18 = math.exp %17 : vector<8x256xf32>
    %cst_13 = arith.constant 1.000000e+00 : f32
    %19 = vector.broadcast %cst_13 : f32 to vector<8x256xf32>
    %20 = arith.addf %19, %18 : vector<8x256xf32>
    %21 = arith.divf %19, %20 : vector<8x256xf32>
    %22 = vector.extract_strided_slice %15 {offsets = [0, 256], sizes = [8, 128], strides = [1, 1]} : vector<8x512xf32> to vector<8x128xf32>
    %23 = math.tanh %22 : vector<8x128xf32>
    %24 = vector.extract_strided_slice %15 {offsets = [0, 384], sizes = [8, 128], strides = [1, 1]} : vector<8x512xf32> to vector<8x128xf32>
    %25 = arith.negf %24 : vector<8x128xf32>
    %26 = math.exp %25 : vector<8x128xf32>
    %cst_14 = arith.constant 1.000000e+00 : f32
    %27 = vector.broadcast %cst_14 : f32 to vector<8x128xf32>
    %28 = arith.addf %27, %26 : vector<8x128xf32>
    %29 = arith.divf %27, %28 : vector<8x128xf32>
    %30 = vector.extract_strided_slice %21 {offsets = [0, 128], sizes = [8, 128], strides = [1, 1]} : vector<8x256xf32> to vector<8x128xf32>
    %31 = arith.mulf %30, %8 : vector<8x128xf32>
    %32 = vector.extract_strided_slice %21 {offsets = [0, 0], sizes = [8, 128], strides = [1, 1]} : vector<8x256xf32> to vector<8x128xf32>
    %33 = arith.mulf %32, %23 : vector<8x128xf32>
    %34 = arith.addf %31, %33 : vector<8x128xf32>
    %35 = math.tanh %34 : vector<8x128xf32>
    %36 = arith.mulf %29, %35 : vector<8x128xf32>
    %c1_i32 = arith.constant 1 : i32
    %c8_i32_15 = arith.constant 8 : i32
    %37 = arith.muli %c1_i32, %c8_i32_15 : i32
    %38 = tpu.assume_multiple %37, 8 : i32
    %39 = arith.index_cast %38 : i32 to index
    %c0_16 = arith.constant 0 : index
    %40 = vector.load %arg7[%39, %c0_16] : memref<64x512xf32, #tpu.memory_space<vmem>>, vector<8x512xf32>
    %c0_17 = arith.constant 0 : index
    %c0_18 = arith.constant 0 : index
    %41 = vector.load %arg2[%c0_17, %c0_18] : memref<128x512xf32, #tpu.memory_space<vmem>>, vector<128x512xf32>
    %cst_19 = arith.constant dense<0.000000e+00> : vector<8x512xf32>
    %42 = tpu.matmul %36, %41, %cst_19 {dimension_numbers = #tpu.dot_dimension_numbers<[1], [0], [0], [1], [0, 0, 1, 1], [], []>} : vector<8x128xf32>, vector<128x512xf32>, vector<8x512xf32> -> vector<8x512xf32>
    %43 = arith.addf %40, %42 : vector<8x512xf32>
    %44 = vector.extract_strided_slice %43 {offsets = [0, 0], sizes = [8, 256], strides = [1, 1]} : vector<8x512xf32> to vector<8x256xf32>
    %45 = arith.negf %44 : vector<8x256xf32>
    %46 = math.exp %45 : vector<8x256xf32>
    %cst_20 = arith.constant 1.000000e+00 : f32
    %47 = vector.broadcast %cst_20 : f32 to vector<8x256xf32>
    %48 = arith.addf %47, %46 : vector<8x256xf32>
    %49 = arith.divf %47, %48 : vector<8x256xf32>
    %50 = vector.extract_strided_slice %43 {offsets = [0, 256], sizes = [8, 128], strides = [1, 1]} : vector<8x512xf32> to vector<8x128xf32>
    %51 = math.tanh %50 : vector<8x128xf32>
    %52 = vector.extract_strided_slice %43 {offsets = [0, 384], sizes = [8, 128], strides = [1, 1]} : vector<8x512xf32> to vector<8x128xf32>
    %53 = arith.negf %52 : vector<8x128xf32>
    %54 = math.exp %53 : vector<8x128xf32>
    %cst_21 = arith.constant 1.000000e+00 : f32
    %55 = vector.broadcast %cst_21 : f32 to vector<8x128xf32>
    %56 = arith.addf %55, %54 : vector<8x128xf32>
    %57 = arith.divf %55, %56 : vector<8x128xf32>
    %58 = vector.extract_strided_slice %49 {offsets = [0, 128], sizes = [8, 128], strides = [1, 1]} : vector<8x256xf32> to vector<8x128xf32>
    %59 = arith.mulf %58, %34 : vector<8x128xf32>
    %60 = vector.extract_strided_slice %49 {offsets = [0, 0], sizes = [8, 128], strides = [1, 1]} : vector<8x256xf32> to vector<8x128xf32>
    %61 = arith.mulf %60, %51 : vector<8x128xf32>
    %62 = arith.addf %59, %61 : vector<8x128xf32>
    %63 = math.tanh %62 : vector<8x128xf32>
    %64 = arith.mulf %57, %63 : vector<8x128xf32>
    %c2_i32 = arith.constant 2 : i32
    %c8_i32_22 = arith.constant 8 : i32
    %65 = arith.muli %c2_i32, %c8_i32_22 : i32
    %66 = tpu.assume_multiple %65, 8 : i32
    %67 = arith.index_cast %66 : i32 to index
    %c0_23 = arith.constant 0 : index
    %68 = vector.load %arg7[%67, %c0_23] : memref<64x512xf32, #tpu.memory_space<vmem>>, vector<8x512xf32>
    %c0_24 = arith.constant 0 : index
    %c0_25 = arith.constant 0 : index
    %69 = vector.load %arg2[%c0_24, %c0_25] : memref<128x512xf32, #tpu.memory_space<vmem>>, vector<128x512xf32>
    %cst_26 = arith.constant dense<0.000000e+00> : vector<8x512xf32>
    %70 = tpu.matmul %64, %69, %cst_26 {dimension_numbers = #tpu.dot_dimension_numbers<[1], [0], [0], [1], [0, 0, 1, 1], [], []>} : vector<8x128xf32>, vector<128x512xf32>, vector<8x512xf32> -> vector<8x512xf32>
    %71 = arith.addf %68, %70 : vector<8x512xf32>
    %72 = vector.extract_strided_slice %71 {offsets = [0, 0], sizes = [8, 256], strides = [1, 1]} : vector<8x512xf32> to vector<8x256xf32>
    %73 = arith.negf %72 : vector<8x256xf32>
    %74 = math.exp %73 : vector<8x256xf32>
    %cst_27 = arith.constant 1.000000e+00 : f32
    %75 = vector.broadcast %cst_27 : f32 to vector<8x256xf32>
    %76 = arith.addf %75, %74 : vector<8x256xf32>
    %77 = arith.divf %75, %76 : vector<8x256xf32>
    %78 = vector.extract_strided_slice %71 {offsets = [0, 256], sizes = [8, 128], strides = [1, 1]} : vector<8x512xf32> to vector<8x128xf32>
    %79 = math.tanh %78 : vector<8x128xf32>
    %80 = vector.extract_strided_slice %71 {offsets = [0, 384], sizes = [8, 128], strides = [1, 1]} : vector<8x512xf32> to vector<8x128xf32>
    %81 = arith.negf %80 : vector<8x128xf32>
    %82 = math.exp %81 : vector<8x128xf32>
    %cst_28 = arith.constant 1.000000e+00 : f32
    %83 = vector.broadcast %cst_28 : f32 to vector<8x128xf32>
    %84 = arith.addf %83, %82 : vector<8x128xf32>
    %85 = arith.divf %83, %84 : vector<8x128xf32>
    %86 = vector.extract_strided_slice %77 {offsets = [0, 128], sizes = [8, 128], strides = [1, 1]} : vector<8x256xf32> to vector<8x128xf32>
    %87 = arith.mulf %86, %62 : vector<8x128xf32>
    %88 = vector.extract_strided_slice %77 {offsets = [0, 0], sizes = [8, 128], strides = [1, 1]} : vector<8x256xf32> to vector<8x128xf32>
    %89 = arith.mulf %88, %79 : vector<8x128xf32>
    %90 = arith.addf %87, %89 : vector<8x128xf32>
    %91 = math.tanh %90 : vector<8x128xf32>
    %92 = arith.mulf %85, %91 : vector<8x128xf32>
    %c3_i32 = arith.constant 3 : i32
    %c8_i32_29 = arith.constant 8 : i32
    %93 = arith.muli %c3_i32, %c8_i32_29 : i32
    %94 = tpu.assume_multiple %93, 8 : i32
    %95 = arith.index_cast %94 : i32 to index
    %c0_30 = arith.constant 0 : index
    %96 = vector.load %arg7[%95, %c0_30] : memref<64x512xf32, #tpu.memory_space<vmem>>, vector<8x512xf32>
    %c0_31 = arith.constant 0 : index
    %c0_32 = arith.constant 0 : index
    %97 = vector.load %arg2[%c0_31, %c0_32] : memref<128x512xf32, #tpu.memory_space<vmem>>, vector<128x512xf32>
    %cst_33 = arith.constant dense<0.000000e+00> : vector<8x512xf32>
    %98 = tpu.matmul %92, %97, %cst_33 {dimension_numbers = #tpu.dot_dimension_numbers<[1], [0], [0], [1], [0, 0, 1, 1], [], []>} : vector<8x128xf32>, vector<128x512xf32>, vector<8x512xf32> -> vector<8x512xf32>
    %99 = arith.addf %96, %98 : vector<8x512xf32>
    %100 = vector.extract_strided_slice %99 {offsets = [0, 0], sizes = [8, 256], strides = [1, 1]} : vector<8x512xf32> to vector<8x256xf32>
    %101 = arith.negf %100 : vector<8x256xf32>
    %102 = math.exp %101 : vector<8x256xf32>
    %cst_34 = arith.constant 1.000000e+00 : f32
    %103 = vector.broadcast %cst_34 : f32 to vector<8x256xf32>
    %104 = arith.addf %103, %102 : vector<8x256xf32>
    %105 = arith.divf %103, %104 : vector<8x256xf32>
    %106 = vector.extract_strided_slice %99 {offsets = [0, 256], sizes = [8, 128], strides = [1, 1]} : vector<8x512xf32> to vector<8x128xf32>
    %107 = math.tanh %106 : vector<8x128xf32>
    %108 = vector.extract_strided_slice %99 {offsets = [0, 384], sizes = [8, 128], strides = [1, 1]} : vector<8x512xf32> to vector<8x128xf32>
    %109 = arith.negf %108 : vector<8x128xf32>
    %110 = math.exp %109 : vector<8x128xf32>
    %cst_35 = arith.constant 1.000000e+00 : f32
    %111 = vector.broadcast %cst_35 : f32 to vector<8x128xf32>
    %112 = arith.addf %111, %110 : vector<8x128xf32>
    %113 = arith.divf %111, %112 : vector<8x128xf32>
    %114 = vector.extract_strided_slice %105 {offsets = [0, 128], sizes = [8, 128], strides = [1, 1]} : vector<8x256xf32> to vector<8x128xf32>
    %115 = arith.mulf %114, %90 : vector<8x128xf32>
    %116 = vector.extract_strided_slice %105 {offsets = [0, 0], sizes = [8, 128], strides = [1, 1]} : vector<8x256xf32> to vector<8x128xf32>
    %117 = arith.mulf %116, %107 : vector<8x128xf32>
    %118 = arith.addf %115, %117 : vector<8x128xf32>
    %119 = math.tanh %118 : vector<8x128xf32>
    %120 = arith.mulf %113, %119 : vector<8x128xf32>
    %c4_i32 = arith.constant 4 : i32
    %c8_i32_36 = arith.constant 8 : i32
    %121 = arith.muli %c4_i32, %c8_i32_36 : i32
    %122 = tpu.assume_multiple %121, 8 : i32
    %123 = arith.index_cast %122 : i32 to index
    %c0_37 = arith.constant 0 : index
    %124 = vector.load %arg7[%123, %c0_37] : memref<64x512xf32, #tpu.memory_space<vmem>>, vector<8x512xf32>
    %c0_38 = arith.constant 0 : index
    %c0_39 = arith.constant 0 : index
    %125 = vector.load %arg2[%c0_38, %c0_39] : memref<128x512xf32, #tpu.memory_space<vmem>>, vector<128x512xf32>
    %cst_40 = arith.constant dense<0.000000e+00> : vector<8x512xf32>
    %126 = tpu.matmul %120, %125, %cst_40 {dimension_numbers = #tpu.dot_dimension_numbers<[1], [0], [0], [1], [0, 0, 1, 1], [], []>} : vector<8x128xf32>, vector<128x512xf32>, vector<8x512xf32> -> vector<8x512xf32>
    %127 = arith.addf %124, %126 : vector<8x512xf32>
    %128 = vector.extract_strided_slice %127 {offsets = [0, 0], sizes = [8, 256], strides = [1, 1]} : vector<8x512xf32> to vector<8x256xf32>
    %129 = arith.negf %128 : vector<8x256xf32>
    %130 = math.exp %129 : vector<8x256xf32>
    %cst_41 = arith.constant 1.000000e+00 : f32
    %131 = vector.broadcast %cst_41 : f32 to vector<8x256xf32>
    %132 = arith.addf %131, %130 : vector<8x256xf32>
    %133 = arith.divf %131, %132 : vector<8x256xf32>
    %134 = vector.extract_strided_slice %127 {offsets = [0, 256], sizes = [8, 128], strides = [1, 1]} : vector<8x512xf32> to vector<8x128xf32>
    %135 = math.tanh %134 : vector<8x128xf32>
    %136 = vector.extract_strided_slice %127 {offsets = [0, 384], sizes = [8, 128], strides = [1, 1]} : vector<8x512xf32> to vector<8x128xf32>
    %137 = arith.negf %136 : vector<8x128xf32>
    %138 = math.exp %137 : vector<8x128xf32>
    %cst_42 = arith.constant 1.000000e+00 : f32
    %139 = vector.broadcast %cst_42 : f32 to vector<8x128xf32>
    %140 = arith.addf %139, %138 : vector<8x128xf32>
    %141 = arith.divf %139, %140 : vector<8x128xf32>
    %142 = vector.extract_strided_slice %133 {offsets = [0, 128], sizes = [8, 128], strides = [1, 1]} : vector<8x256xf32> to vector<8x128xf32>
    %143 = arith.mulf %142, %118 : vector<8x128xf32>
    %144 = vector.extract_strided_slice %133 {offsets = [0, 0], sizes = [8, 128], strides = [1, 1]} : vector<8x256xf32> to vector<8x128xf32>
    %145 = arith.mulf %144, %135 : vector<8x128xf32>
    %146 = arith.addf %143, %145 : vector<8x128xf32>
    %147 = math.tanh %146 : vector<8x128xf32>
    %148 = arith.mulf %141, %147 : vector<8x128xf32>
    %c5_i32 = arith.constant 5 : i32
    %c8_i32_43 = arith.constant 8 : i32
    %149 = arith.muli %c5_i32, %c8_i32_43 : i32
    %150 = tpu.assume_multiple %149, 8 : i32
    %151 = arith.index_cast %150 : i32 to index
    %c0_44 = arith.constant 0 : index
    %152 = vector.load %arg7[%151, %c0_44] : memref<64x512xf32, #tpu.memory_space<vmem>>, vector<8x512xf32>
    %c0_45 = arith.constant 0 : index
    %c0_46 = arith.constant 0 : index
    %153 = vector.load %arg2[%c0_45, %c0_46] : memref<128x512xf32, #tpu.memory_space<vmem>>, vector<128x512xf32>
    %cst_47 = arith.constant dense<0.000000e+00> : vector<8x512xf32>
    %154 = tpu.matmul %148, %153, %cst_47 {dimension_numbers = #tpu.dot_dimension_numbers<[1], [0], [0], [1], [0, 0, 1, 1], [], []>} : vector<8x128xf32>, vector<128x512xf32>, vector<8x512xf32> -> vector<8x512xf32>
    %155 = arith.addf %152, %154 : vector<8x512xf32>
    %156 = vector.extract_strided_slice %155 {offsets = [0, 0], sizes = [8, 256], strides = [1, 1]} : vector<8x512xf32> to vector<8x256xf32>
    %157 = arith.negf %156 : vector<8x256xf32>
    %158 = math.exp %157 : vector<8x256xf32>
    %cst_48 = arith.constant 1.000000e+00 : f32
    %159 = vector.broadcast %cst_48 : f32 to vector<8x256xf32>
    %160 = arith.addf %159, %158 : vector<8x256xf32>
    %161 = arith.divf %159, %160 : vector<8x256xf32>
    %162 = vector.extract_strided_slice %155 {offsets = [0, 256], sizes = [8, 128], strides = [1, 1]} : vector<8x512xf32> to vector<8x128xf32>
    %163 = math.tanh %162 : vector<8x128xf32>
    %164 = vector.extract_strided_slice %155 {offsets = [0, 384], sizes = [8, 128], strides = [1, 1]} : vector<8x512xf32> to vector<8x128xf32>
    %165 = arith.negf %164 : vector<8x128xf32>
    %166 = math.exp %165 : vector<8x128xf32>
    %cst_49 = arith.constant 1.000000e+00 : f32
    %167 = vector.broadcast %cst_49 : f32 to vector<8x128xf32>
    %168 = arith.addf %167, %166 : vector<8x128xf32>
    %169 = arith.divf %167, %168 : vector<8x128xf32>
    %170 = vector.extract_strided_slice %161 {offsets = [0, 128], sizes = [8, 128], strides = [1, 1]} : vector<8x256xf32> to vector<8x128xf32>
    %171 = arith.mulf %170, %146 : vector<8x128xf32>
    %172 = vector.extract_strided_slice %161 {offsets = [0, 0], sizes = [8, 128], strides = [1, 1]} : vector<8x256xf32> to vector<8x128xf32>
    %173 = arith.mulf %172, %163 : vector<8x128xf32>
    %174 = arith.addf %171, %173 : vector<8x128xf32>
    %175 = math.tanh %174 : vector<8x128xf32>
    %176 = arith.mulf %169, %175 : vector<8x128xf32>
    %c6_i32 = arith.constant 6 : i32
    %c8_i32_50 = arith.constant 8 : i32
    %177 = arith.muli %c6_i32, %c8_i32_50 : i32
    %178 = tpu.assume_multiple %177, 8 : i32
    %179 = arith.index_cast %178 : i32 to index
    %c0_51 = arith.constant 0 : index
    %180 = vector.load %arg7[%179, %c0_51] : memref<64x512xf32, #tpu.memory_space<vmem>>, vector<8x512xf32>
    %c0_52 = arith.constant 0 : index
    %c0_53 = arith.constant 0 : index
    %181 = vector.load %arg2[%c0_52, %c0_53] : memref<128x512xf32, #tpu.memory_space<vmem>>, vector<128x512xf32>
    %cst_54 = arith.constant dense<0.000000e+00> : vector<8x512xf32>
    %182 = tpu.matmul %176, %181, %cst_54 {dimension_numbers = #tpu.dot_dimension_numbers<[1], [0], [0], [1], [0, 0, 1, 1], [], []>} : vector<8x128xf32>, vector<128x512xf32>, vector<8x512xf32> -> vector<8x512xf32>
    %183 = arith.addf %180, %182 : vector<8x512xf32>
    %184 = vector.extract_strided_slice %183 {offsets = [0, 0], sizes = [8, 256], strides = [1, 1]} : vector<8x512xf32> to vector<8x256xf32>
    %185 = arith.negf %184 : vector<8x256xf32>
    %186 = math.exp %185 : vector<8x256xf32>
    %cst_55 = arith.constant 1.000000e+00 : f32
    %187 = vector.broadcast %cst_55 : f32 to vector<8x256xf32>
    %188 = arith.addf %187, %186 : vector<8x256xf32>
    %189 = arith.divf %187, %188 : vector<8x256xf32>
    %190 = vector.extract_strided_slice %183 {offsets = [0, 256], sizes = [8, 128], strides = [1, 1]} : vector<8x512xf32> to vector<8x128xf32>
    %191 = math.tanh %190 : vector<8x128xf32>
    %192 = vector.extract_strided_slice %183 {offsets = [0, 384], sizes = [8, 128], strides = [1, 1]} : vector<8x512xf32> to vector<8x128xf32>
    %193 = arith.negf %192 : vector<8x128xf32>
    %194 = math.exp %193 : vector<8x128xf32>
    %cst_56 = arith.constant 1.000000e+00 : f32
    %195 = vector.broadcast %cst_56 : f32 to vector<8x128xf32>
    %196 = arith.addf %195, %194 : vector<8x128xf32>
    %197 = arith.divf %195, %196 : vector<8x128xf32>
    %198 = vector.extract_strided_slice %189 {offsets = [0, 128], sizes = [8, 128], strides = [1, 1]} : vector<8x256xf32> to vector<8x128xf32>
    %199 = arith.mulf %198, %174 : vector<8x128xf32>
    %200 = vector.extract_strided_slice %189 {offsets = [0, 0], sizes = [8, 128], strides = [1, 1]} : vector<8x256xf32> to vector<8x128xf32>
    %201 = arith.mulf %200, %191 : vector<8x128xf32>
    %202 = arith.addf %199, %201 : vector<8x128xf32>
    %203 = math.tanh %202 : vector<8x128xf32>
    %204 = arith.mulf %197, %203 : vector<8x128xf32>
    %c7_i32 = arith.constant 7 : i32
    %c8_i32_57 = arith.constant 8 : i32
    %205 = arith.muli %c7_i32, %c8_i32_57 : i32
    %206 = tpu.assume_multiple %205, 8 : i32
    %207 = arith.index_cast %206 : i32 to index
    %c0_58 = arith.constant 0 : index
    %208 = vector.load %arg7[%207, %c0_58] : memref<64x512xf32, #tpu.memory_space<vmem>>, vector<8x512xf32>
    %c0_59 = arith.constant 0 : index
    %c0_60 = arith.constant 0 : index
    %209 = vector.load %arg2[%c0_59, %c0_60] : memref<128x512xf32, #tpu.memory_space<vmem>>, vector<128x512xf32>
    %cst_61 = arith.constant dense<0.000000e+00> : vector<8x512xf32>
    %210 = tpu.matmul %204, %209, %cst_61 {dimension_numbers = #tpu.dot_dimension_numbers<[1], [0], [0], [1], [0, 0, 1, 1], [], []>} : vector<8x128xf32>, vector<128x512xf32>, vector<8x512xf32> -> vector<8x512xf32>
    %211 = arith.addf %208, %210 : vector<8x512xf32>
    %212 = vector.extract_strided_slice %211 {offsets = [0, 0], sizes = [8, 256], strides = [1, 1]} : vector<8x512xf32> to vector<8x256xf32>
    %213 = arith.negf %212 : vector<8x256xf32>
    %214 = math.exp %213 : vector<8x256xf32>
    %cst_62 = arith.constant 1.000000e+00 : f32
    %215 = vector.broadcast %cst_62 : f32 to vector<8x256xf32>
    %216 = arith.addf %215, %214 : vector<8x256xf32>
    %217 = arith.divf %215, %216 : vector<8x256xf32>
    %218 = vector.extract_strided_slice %211 {offsets = [0, 256], sizes = [8, 128], strides = [1, 1]} : vector<8x512xf32> to vector<8x128xf32>
    %219 = math.tanh %218 : vector<8x128xf32>
    %220 = vector.extract_strided_slice %211 {offsets = [0, 384], sizes = [8, 128], strides = [1, 1]} : vector<8x512xf32> to vector<8x128xf32>
    %221 = arith.negf %220 : vector<8x128xf32>
    %222 = math.exp %221 : vector<8x128xf32>
    %cst_63 = arith.constant 1.000000e+00 : f32
    %223 = vector.broadcast %cst_63 : f32 to vector<8x128xf32>
    %224 = arith.addf %223, %222 : vector<8x128xf32>
    %225 = arith.divf %223, %224 : vector<8x128xf32>
    %226 = vector.extract_strided_slice %217 {offsets = [0, 128], sizes = [8, 128], strides = [1, 1]} : vector<8x256xf32> to vector<8x128xf32>
    %227 = arith.mulf %226, %202 : vector<8x128xf32>
    %228 = vector.extract_strided_slice %217 {offsets = [0, 0], sizes = [8, 128], strides = [1, 1]} : vector<8x256xf32> to vector<8x128xf32>
    %229 = arith.mulf %228, %219 : vector<8x128xf32>
    %230 = arith.addf %227, %229 : vector<8x128xf32>
    %231 = math.tanh %230 : vector<8x128xf32>
    %232 = arith.mulf %225, %231 : vector<8x128xf32>
    %c8_i32_64 = arith.constant 8 : i32
    %c0_65 = arith.constant 0 : index
    %c0_66 = arith.constant 0 : index
    %233 = vector.load %arg4[%c0_65, %c0_66] : memref<128x128xf32, #tpu.memory_space<vmem>>, vector<128x128xf32>
    %cst_67 = arith.constant dense<0.000000e+00> : vector<8x128xf32>
    %234 = tpu.matmul %232, %233, %cst_67 {dimension_numbers = #tpu.dot_dimension_numbers<[1], [0], [0], [1], [0, 0, 1, 1], [], []>} : vector<8x128xf32>, vector<128x128xf32>, vector<8x128xf32> -> vector<8x128xf32>
    %c0_68 = arith.constant 0 : index
    %c0_69 = arith.constant 0 : index
    %235 = vector.load %arg5[%c0_68, %c0_69] : memref<1x128xf32, #tpu.memory_space<vmem>>, vector<1x128xf32>
    %236 = vector.broadcast %235 : vector<1x128xf32> to vector<8x128xf32>
    %237 = arith.addf %234, %236 : vector<8x128xf32>
    %c0_70 = arith.constant 0 : index
    %c0_71 = arith.constant 0 : index
    %238 = vector.load %arg6[%c0_70, %c0_71] : memref<8x128xf32, #tpu.memory_space<vmem>>, vector<8x128xf32>
    tpu.vector_store %arg6[%c0_70, %c0_71], %237 {strides = array<i32>} : memref<8x128xf32, #tpu.memory_space<vmem>>, vector<8x128xf32>,
    return
  }
}

</mosaic_0001>

<bundles_post_ra>
// kernel: tpu_custom_call.1
= control target key start
LH: loop header
LB: loop body
LE: loop exit
PB: predicated region body
PF: predicated region fallthrough
CT: control target
= control target key end

     0   :  { %11 = vsyncpa [#allocation4], 0  ;;  %s3538_s0 = inlined_call_operand.vmem [shape: f32[64,28], index: 0, kind: input, shape index: {}]   ;;  %s3539_s1 = inlined_call_operand.hbm [shape: f32[28,512], index: 1, kind: input, shape index: {}]   ;;  %s3540_s2 = inlined_call_operand.hbm [shape: f32[128,512], index: 2, kind: input, shape index: {}]   ;;  %s3541_s3 = inlined_call_operand.vmem [shape: f32[1,512], index: 3, kind: input, shape index: {}]   ;;  %s3542_s4 = inlined_call_operand.hbm [shape: f32[128,128], index: 4, kind: input, shape index: {}]   ;;  %s3543_s5 = inlined_call_operand.vmem [shape: f32[1,128], index: 5, kind: input, shape index: {}]   ;;  %s3544_s6 = inlined_call_operand.hbm [shape: f32[8,128], index: 6, kind: output, shape index: {}]  }
   0x1   :  { %12 = vsyncpa [#allocation7], 0 }
   0x2   :  { %13 = vsyncpa [#allocation5], 0  ;;  %s2955_s21 = smov [#allocation6]   ;;  %s2956_s23 = smov [#allocation3]  }
   0x3   :  { %s33_s22 = sshll.u32 %s2955_s21, 4  ;;  %s21_s24 = sshll.u32 %s2956_s23, 4  ;;  %s34_s22 = int_to_ptr.vmem [resolvable:$true] %s33_s22  ;;  %s3002_s24 = int_to_ptr.vmem [resolvable:$true] %s21_s24 }
   0x4   :  { %s2861_s27 = scalar_lea.hbm %s3540_s2, 8192 }
   0x5   :  { %p2862_p0 = scmp.ne.s32.totalorder %s3540_s2, %s2861_s27  ;;  %p2865_p1 = scmp.lt.u32.totalorder %s2861_s27, %s3540_s2 }
   0x7   :  { %p2867_p2 = pnand %p2865_p1, %p2862_p0 }
   0x9   :  { %2870 = shalt.err (!%p2867_p2)
}
   0xa   :  { %s2871_s8 = scalar_lea.vmem %s34_s22, 8192  ;;  %p2876_p4 = scmp.lt.s32.totalorder %s34_s22, %s34_s22 }
   0xb   :  { %p2872_p3 = scmp.ne.s32.totalorder %s34_s22, %s2871_s8  ;;  %p2877_p5 = scmp.lt.s32.totalorder %s2871_s8, %s2871_s8 }
   0xd   :  { %p2878_p6 = por %p2877_p5, %p2876_p4 }
   0xf   :  { %p2879_p7 = pnand %p2878_p6, %p2872_p3 }
  0x11   :  { %2882 = shalt.err (!%p2879_p7)
}
  0x12   :  { %s2957_s9 = smov 512   ;;  %s2958_s10 = smov 32  }
  0x13   :  { %39 = dma.hbm_to_vmem [thread:$0]  %s3540_s2, 8192, %s34_s22, [#allocation7], %s2957_s9, %s2957_s9, %s2958_s10  }
  0x14   :  { %s2883_s15 = scalar_lea.hbm %s3539_s1, 2048 }
  0x15   :  { %p2884_p8 = scmp.ne.s32.totalorder %s3539_s1, %s2883_s15  ;;  %p2887_p9 = scmp.lt.u32.totalorder %s2883_s15, %s3539_s1 }
  0x17   :  { %p2889_p10 = pnand %p2887_p9, %p2884_p8 }
  0x19   :  { %2892 = shalt.err (!%p2889_p10)
}
  0x1a   :  { %s2893_s20 = scalar_lea.vmem %s3002_s24, 2048  ;;  %p2898_p12 = scmp.lt.s32.totalorder %s3002_s24, %s3002_s24 }
  0x1b   :  { %p2894_p11 = scmp.ne.s32.totalorder %s3002_s24, %s2893_s20  ;;  %p2899_p13 = scmp.lt.s32.totalorder %s2893_s20, %s2893_s20 }
  0x1d   :  { %p2900_p0 = por %p2899_p13, %p2898_p12 }
  0x1f   :  { %p2901_p1 = pnand %p2900_p0, %p2894_p11 }
  0x21   :  { %2904 = shalt.err (!%p2901_p1)
}
  0x22   :  { %27 = dma.hbm_to_vmem [thread:$0]  %s3539_s1, 2048, %s3002_s24, [#allocation4], %s2957_s9, %s2957_s9, %s2958_s10  }
  0x23   :  { %s2959_s22 = smov [#allocation8]   ;;  %s2905_s27 = scalar_lea.hbm %s3542_s4, 2048 }
  0x24   :  { %s47_s23 = sshll.u32 %s2959_s22, 4  ;;  %p2906_p2 = scmp.ne.s32.totalorder %s3542_s4, %s2905_s27  ;;  %s48_s23 = int_to_ptr.vmem [resolvable:$true] %s47_s23 }
  0x25   :  { %p2909_p3 = scmp.lt.u32.totalorder %s2905_s27, %s3542_s4 }
  0x27   :  { %p2911_p4 = pnand %p2909_p3, %p2906_p2 }
  0x29   :  { %2914 = shalt.err (!%p2911_p4)
}
  0x2a   :  { %s2915_s8 = scalar_lea.vmem %s48_s23, 2048  ;;  %p2920_p6 = scmp.lt.s32.totalorder %s48_s23, %s48_s23 }
  0x2b   :  { %p2916_p5 = scmp.ne.s32.totalorder %s48_s23, %s2915_s8  ;;  %p2921_p7 = scmp.lt.s32.totalorder %s2915_s8, %s2915_s8 }
  0x2d   :  { %p2922_p8 = por %p2921_p7, %p2920_p6 }
  0x2f   :  { %p2923_p9 = pnand %p2922_p8, %p2916_p5 }
  0x31   :  { %2926 = shalt.err (!%p2923_p9)
}
  0x32   :  { %s2960_s1 = smov 128   ;;  %s2961_s24 = smov 8  }
  0x33   :  { %53 = dma.hbm_to_vmem [thread:$0]  %s3542_s4, 2048, %s48_s23, [#allocation7], %s2960_s1, %s2960_s1, %s2961_s24  }
  0x34   :  { %2949 = dma.done.wait [#allocation4], 2048  }
  0x35   :  { %2950 = vsyncadd [#allocation4], 4294965248 }
  0x36   :  { %2951 = dma.done.wait [#allocation7], 10240  }
  0x37   :  { %2952 = vsyncadd [#allocation7], 4294957056  ;;  %v2962_v0 = vmov 0.0   ;;  %vm136_vm0 = vcmask 1043456   ;;  %vm2963_vm1 = vmmov 1   ;;  %v74_v2 = vld [vmem:[#allocation3 + $0x8] sm:$0xff] }
  0x38   :  { %213 = vmatprep.mubr.f32.mxu0 %v2962_v0  ;;  %326 = vmatprep.mubr.f32.mxu1 %v2962_v0  ;;  %vm3047_vm2 = vmpackc.low %vm136_vm0, %vm2963_vm1  ;;  %v78_v3 = vld [vmem:[#allocation3 + $0x28] sm:$0xff]  ;;  %v76_v4 = vld [vmem:[#allocation3 + $0x18] sm:$0xff]  ;;  %vm111_vm3 = vcmask 228352   ;;  %vm2965_vm4 = vmmov 0   ;;  %s2966_s28 = smov [#allocation9]  }
  0x39   :  { %v2101_v5 = vpack.c.bf16 %v78_v3, %v74_v2  ;;  %v80_v6 = vld [vmem:[#allocation3 + $0x38] sm:$0xff]  ;;  %v73_v7 = vld [vmem:[#allocation3] sm:$0xff]  ;;  %v75_v11 = vld [vmem:[#allocation3 + $0x10] sm:$0xff]  ;;  %s1987_s29 = sshll.u32 %s2966_s28, 4  ;;  %s1988_s29 = int_to_ptr.vmem [resolvable:$true] %s1987_s29 }
  0x3a   :  { %v77_v8 = vld [vmem:[#allocation3 + $0x20] sm:$0xff]  ;;  %v2111_v9 = vpack.c.bf16 %v80_v6, %v76_v4  ;;  %v79_v12 = vld [vmem:[#allocation3 + $0x30] sm:$0xff]  ;;  %v82_v13 = vld [vmem:[#allocation3 + $0x48] sm:$0xff]  ;;  %s2927_s30 = scalar_lea.vmem %s1988_s29, 128  ;;  %p2932_p11 = scmp.lt.s32.totalorder %s1988_s29, %s1988_s29 }
  0x3b   :  { %v2103_v10 = vpack.c.bf16 %v77_v8, %v73_v7  ;;  %2102 = vmatprep.subr.bf16.mxu0 %v2101_v5  ;;  %v2113_v14 = vpack.c.bf16 %v79_v12, %v75_v11  ;;  %v86_v15 = vld [vmem:[#allocation3 + $0x68] sm:$0xf]  ;;  %v84_v16 = vld [vmem:[#allocation3 + $0x58] sm:$0xff]  ;;  %v81_v20 = vld [vmem:[#allocation3 + $0x40] sm:$0xff]  ;;  %p2928_p10 = scmp.ne.s32.totalorder %s1988_s29, %s2927_s30  ;;  %p2933_p12 = scmp.lt.s32.totalorder %s2927_s30, %s2927_s30 }
  0x3c   :  { %v88_v17 = vld [vmem:[#allocation3 + $0x78] sm:$0xf]  ;;  %2112 = vmatprep.subr.bf16.mxu1 %v2111_v9  ;;  %v2105_v18 = vpack.c.bf16 %v86_v15, %v82_v13  ;;  %v85_v21 = vld [vmem:[#allocation3 + $0x60] sm:$0xf]  ;;  %v83_v22 = vld [vmem:[#allocation3 + $0x50] sm:$0xff] }
  0x3d   :  { %2104 = vmatpush1.bf16.msra.mxu0 %v2103_v10  ;;  %v2115_v19 = vpack.c.bf16 %v88_v17, %v84_v16  ;;  %2114 = vmatpush1.bf16.msra.mxu1 %v2113_v14  ;;  %v2108_v23 = vpack.c.bf16 %v85_v21, %v81_v20  ;;  %v87_v24 = vld [vmem:[#allocation3 + $0x70] sm:$0xf]  ;;  %v415_v25 = vld [vmem:[#allocation6 + $0x8] sm:$0xff]  ;;  %v417_v28 = vld [vmem:[#allocation6 + $0x18] sm:$0xff]  ;;  %p2934_p13 = por %p2933_p12, %p2932_p11 }
  0x3e   :  { %2107 = vmatprep.subr.msk.bf16.mxu0 %vm3047_vm2, %v2105_v18  ;;  %v2118_v26 = vpack.c.bf16 %v87_v24, %v83_v22  ;;  %v419_v27 = vld [vmem:[#allocation6 + $0x28] sm:$0xff]  ;;  %v421_v29 = vld [vmem:[#allocation6 + $0x38] sm:$0xff]  ;;  %v414_v32 = vld [vmem:[#allocation6] sm:$0xff] }
  0x3f   :  { %2117 = vmatprep.subr.msk.bf16.mxu1 %vm3047_vm2, %v2115_v19  ;;  %v3055_v30 = vpack.c.bf16 %v419_v27, %v415_v25  ;;  %v3057_v31 = vpack.c.bf16 %v421_v29, %v417_v28  ;;  %v418_v33 = vld [vmem:[#allocation6 + $0x20] sm:$0xff]  ;;  %v416_v34 = vld [vmem:[#allocation6 + $0x10] sm:$0xff]  ;;  %v423_v38 = vld [vmem:[#allocation6 + $0x48] sm:$0xff]  ;;  %p2935_p0 = pnand %p2934_p13, %p2928_p10 }
  0x40   :  { %v65_v35 = vld [vmem:[%s3538_s0] sm:$0xff]  ;;  %v3064_v36 = vpack.c.bf16 %v418_v33, %v414_v32  ;;  %v420_v37 = vld [vmem:[#allocation6 + $0x30] sm:$0xff]  ;;  %v427_v40 = vld [vmem:[#allocation6 + $0x68] sm:$0xff] }
  0x41   :  { %2110 = vmatpush1.bf16.msk.msra.mxu0 %vm3047_vm2, %v2108_v23  ;;  %2120 = vmatpush1.bf16.msk.msra.mxu1 %vm3047_vm2, %v2118_v26  ;;  %v3069_v39 = vpack.c.bf16 %v420_v37, %v416_v34  ;;  %v425_v41 = vld [vmem:[#allocation6 + $0x58] sm:$0xff]  ;;  %v3072_v43 = vpack.c.bf16 %v427_v40, %v423_v38  ;;  %v422_v44 = vld [vmem:[#allocation6 + $0x40] sm:$0xff]  ;;  %v424_v46 = vld [vmem:[#allocation6 + $0x50] sm:$0xff] }
  0x42   :  { %2122 = vmatprep.subr.bf16.mxu0 %v3055_v30  ;;  %v429_v42 = vld [vmem:[#allocation6 + $0x78] sm:$0xff]  ;;  %2154 = vmatprep.subr.bf16.mxu1 %v3057_v31  ;;  %v426_v45 = vld [vmem:[#allocation6 + $0x60] sm:$0xff]  ;;  %v66_v47 = vld [vmem:[%s3538_s0 + $0x8] sm:$0xff] }
  0x43   :  { %v3078_v48 = vpack.c.bf16 %v429_v42, %v425_v41  ;;  %v428_v49 = vld [vmem:[#allocation6 + $0x70] sm:$0xff]  ;;  %v431_v50 = vld [vmem:[#allocation6 + $0x88] sm:$0xff]  ;;  %v3082_v51 = vpack.c.bf16 %v426_v45, %v422_v44  ;;  %v433_v53 = vld [vmem:[#allocation6 + $0x98] sm:$0xff] }
  0x44   :  { %2006 = vmatmul.mubr.msk.f32.vlgmr.msra.gmra.mrb[0].mxu0 %vm111_vm3, %v65_v35  ;;  %2016 = vmatmul.mubr.msk.f32.vlgmr.msra.gmra.mrb[0].mxu1 %vm111_vm3, %v65_v35  ;;  %v435_v52 = vld [vmem:[#allocation6 + $0xa8] sm:$0xff]  ;;  %v437_v54 = vld [vmem:[#allocation6 + $0xb8] sm:$0xff]  ;;  %v3086_v55 = vpack.c.bf16 %v428_v49, %v424_v46  ;;  %v430_v56 = vld [vmem:[#allocation6 + $0x80] sm:$0xff] }
  0x45   :  { %2124 = vmatpush1.bf16.msra.mxu0 %v3064_v36  ;;  %2156 = vmatpush1.bf16.msra.mxu1 %v3069_v39  ;;  %v434_v57 = vld [vmem:[#allocation6 + $0xa0] sm:$0xff]  ;;  %v3090_v58 = vpack.c.bf16 %v435_v52, %v431_v50  ;;  %v432_v59 = vld [vmem:[#allocation6 + $0x90] sm:$0xff]  ;;  %v3094_v61 = vpack.c.bf16 %v437_v54, %v433_v53  ;;  %v439_v62 = vld [vmem:[#allocation6 + $0xc8] sm:$0xff] }
  0x46   :  { %219 = vmatprep.mubr.f32.mxu0 %v2962_v0  ;;  %332 = vmatprep.mubr.f32.mxu1 %v2962_v0  ;;  %v436_v60 = vld [vmem:[#allocation6 + $0xb0] sm:$0xff]  ;;  %v443_v63 = vld [vmem:[#allocation6 + $0xe8] sm:$0xff]  ;;  %v3101_v2 = vpack.c.bf16 %v434_v57, %v430_v56  ;;  %v441_v3 = vld [vmem:[#allocation6 + $0xd8] sm:$0xff] }
  0x47   :  { %2126 = vmatprep.subr.bf16.mxu0 %v3072_v43  ;;  %2158 = vmatprep.subr.bf16.mxu1 %v3078_v48  ;;  %v67_v1 = vld [vmem:[%s3538_s0 + $0x10] sm:$0xff]  ;;  %v445_v4 = vld [vmem:[#allocation6 + $0xf8] sm:$0xff]  ;;  %v3105_v5 = vpack.c.bf16 %v436_v60, %v432_v59  ;;  %v438_v6 = vld [vmem:[#allocation6 + $0xc0] sm:$0xff]  ;;  %v3109_v8 = vpack.c.bf16 %v443_v63, %v439_v62 }
  0x48   :  { %2007 = vmatmul.mubr.msk.f32.gmra.mrb[2].mxu0 %vm111_vm3, %v66_v47  ;;  %2017 = vmatmul.mubr.msk.f32.gmra.mrb[2].mxu1 %vm111_vm3, %v66_v47  ;;  %v442_v7 = vld [vmem:[#allocation6 + $0xe0] sm:$0xff]  ;;  %v440_v9 = vld [vmem:[#allocation6 + $0xd0] sm:$0xff]  ;;  %v3113_v11 = vpack.c.bf16 %v445_v4, %v441_v3  ;;  %v447_v12 = vld [vmem:[#allocation6 + $0x108] sm:$0xff] }
  0x49   :  { %2128 = vmatpush1.bf16.msra.mxu0 %v3082_v51  ;;  %2160 = vmatpush1.bf16.msra.mxu1 %v3086_v55  ;;  %v444_v10 = vld [vmem:[#allocation6 + $0xf0] sm:$0xff]  ;;  %v451_v13 = vld [vmem:[#allocation6 + $0x128] sm:$0xff]  ;;  %v68_v14 = vld [vmem:[%s3538_s0 + $0x18] sm:$0xff]  ;;  %v3120_v15 = vpack.c.bf16 %v442_v7, %v438_v6 }
  0x4a   :  { %225 = vmatprep.mubr.f32.mxu0 %v2962_v0  ;;  %338 = vmatprep.mubr.f32.mxu1 %v2962_v0  ;;  %v449_v16 = vld [vmem:[#allocation6 + $0x118] sm:$0xff]  ;;  %v3124_v18 = vpack.c.bf16 %v444_v10, %v440_v9  ;;  %v446_v19 = vld [vmem:[#allocation6 + $0x100] sm:$0xff]  ;;  %v3128_v21 = vpack.c.bf16 %v451_v13, %v447_v12  ;;  %v448_v22 = vld [vmem:[#allocation6 + $0x110] sm:$0xff] }
  0x4b   :  { %2130 = vmatprep.subr.bf16.mxu0 %v3090_v58  ;;  %2162 = vmatprep.subr.bf16.mxu1 %v3094_v61  ;;  %v453_v17 = vld [vmem:[#allocation6 + $0x138] sm:$0xff]  ;;  %v450_v20 = vld [vmem:[#allocation6 + $0x120] sm:$0xff]  ;;  %v452_v23 = vld [vmem:[#allocation6 + $0x130] sm:$0xff] }
  0x4c   :  { %2008 = vmatmul.mubr.msk.f32.gmra.mrb[4].mxu0 %vm111_vm3, %v67_v1  ;;  %2018 = vmatmul.mubr.msk.f32.gmra.mrb[4].mxu1 %vm111_vm3, %v67_v1  ;;  %v3132_v24 = vpack.c.bf16 %v453_v17, %v449_v16  ;;  %v455_v25 = vld [vmem:[#allocation6 + $0x148] sm:$0xff]  ;;  %v69_v27 = vld [vmem:[%s3538_s0 + $0x20] sm:$0xff]  ;;  %v3139_v28 = vpack.c.bf16 %v450_v20, %v446_v19  ;;  %v457_v29 = vld [vmem:[#allocation6 + $0x158] sm:$0xff]  ;;  %v3143_v33 = vpack.c.bf16 %v452_v23, %v448_v22  ;;  %v91_v20 = vlaneseq }
  0x4d   :  { %2132 = vmatpush1.bf16.msra.mxu0 %v3101_v2  ;;  %2164 = vmatpush1.bf16.msra.mxu1 %v3105_v5  ;;  %v459_v26 = vld [vmem:[#allocation6 + $0x168] sm:$0xff]  ;;  %v461_v32 = vld [vmem:[#allocation6 + $0x178] sm:$0xff]  ;;  %v454_v34 = vld [vmem:[#allocation6 + $0x140] sm:$0xff] }
  0x4e   :  { %231 = vmatprep.mubr.f32.mxu0 %v2962_v0  ;;  %344 = vmatprep.mubr.f32.mxu1 %v2962_v0  ;;  %v458_v35 = vld [vmem:[#allocation6 + $0x160] sm:$0xff]  ;;  %v3147_v37 = vpack.c.bf16 %v459_v26, %v455_v25  ;;  %v456_v38 = vld [vmem:[#allocation6 + $0x150] sm:$0xff]  ;;  %v3151_v41 = vpack.c.bf16 %v461_v32, %v457_v29  ;;  %v463_v42 = vld [vmem:[#allocation6 + $0x188] sm:$0xff]  ;;  %v92_v22 = vshrl.u32 %v91_v20, 7 }
  0x4f   :  { %2134 = vmatprep.subr.bf16.mxu0 %v3109_v8  ;;  %2166 = vmatprep.subr.bf16.mxu1 %v3113_v11  ;;  %v460_v40 = vld [vmem:[#allocation6 + $0x170] sm:$0xff]  ;;  %v467_v44 = vld [vmem:[#allocation6 + $0x1a8] sm:$0xff]  ;;  %v3158_v46 = vpack.c.bf16 %v458_v35, %v454_v34  ;;  %v465_v47 = vld [vmem:[#allocation6 + $0x198] sm:$0xff] }
  0x50   :  { %2009 = vmatmul.mubr.msk.f32.gmra.mrb[6].mxu0 %vm111_vm3, %v68_v14  ;;  %2019 = vmatmul.mubr.msk.f32.gmra.mrb[6].mxu1 %vm111_vm3, %v68_v14  ;;  %v70_v45 = vld [vmem:[%s3538_s0 + $0x28] sm:$0xff]  ;;  %v469_v49 = vld [vmem:[#allocation6 + $0x1b8] sm:$0xff]  ;;  %v3162_v50 = vpack.c.bf16 %v460_v40, %v456_v38  ;;  %v462_v52 = vld [vmem:[#allocation6 + $0x180] sm:$0xff]  ;;  %v3166_v54 = vpack.c.bf16 %v467_v44, %v463_v42  ;;  %v93_v23 = vsub.s32 0, %v92_v22  ;;  %v97_v26 = vsub.s32 1, %v92_v22 }
  0x51   :  { %2136 = vmatpush1.bf16.msra.mxu0 %v3120_v15  ;;  %2168 = vmatpush1.bf16.msra.mxu1 %v3124_v18  ;;  %v466_v53 = vld [vmem:[#allocation6 + $0x1a0] sm:$0xff]  ;;  %v464_v56 = vld [vmem:[#allocation6 + $0x190] sm:$0xff]  ;;  %v3170_v59 = vpack.c.bf16 %v469_v49, %v465_v47  ;;  %v471_v60 = vld [vmem:[#allocation6 + $0x1c8] sm:$0xff]  ;;  %v105_v34 = vsub.s32 3, %v92_v22 }
  0x52   :  { %237 = vmatprep.mubr.f32.mxu0 %v2962_v0  ;;  %350 = vmatprep.mubr.f32.mxu1 %v2962_v0  ;;  %v468_v57 = vld [vmem:[#allocation6 + $0x1b0] sm:$0xff]  ;;  %v475_v62 = vld [vmem:[#allocation6 + $0x1e8] sm:$0xff]  ;;  %v3177_v1 = vpack.c.bf16 %v466_v53, %v462_v52  ;;  %v473_v3 = vld [vmem:[#allocation6 + $0x1d8] sm:$0xff]  ;;  %v101_v52 = vsub.s32 2, %v92_v22 }
  0x53   :  { %2138 = vmatprep.subr.bf16.mxu0 %v3128_v21  ;;  %2170 = vmatprep.subr.bf16.mxu1 %v3132_v24  ;;  %v71_v63 = vld [vmem:[%s3538_s0 + $0x30] sm:$0xff]  ;;  %v477_v4 = vld [vmem:[#allocation6 + $0x1f8] sm:$0xff]  ;;  %v3181_v6 = vpack.c.bf16 %v468_v57, %v464_v56  ;;  %v470_v7 = vld [vmem:[#allocation6 + $0x1c0] sm:$0xff]  ;;  %v3185_v10 = vpack.c.bf16 %v475_v62, %v471_v60 }
  0x54   :  { %2010 = vmatmul.mubr.msk.f32.gmra.mrb[8].mxu0 %vm111_vm3, %v69_v27  ;;  %2020 = vmatmul.mubr.msk.f32.gmra.mrb[8].mxu1 %vm111_vm3, %v69_v27  ;;  %v474_v9 = vld [vmem:[#allocation6 + $0x1e0] sm:$0xff]  ;;  %v472_v12 = vld [vmem:[#allocation6 + $0x1d0] sm:$0xff]  ;;  %v3189_v14 = vpack.c.bf16 %v477_v4, %v473_v3  ;;  %v72_v16 = vld [vmem:[%s3538_s0 + $0x38] sm:$0xff] }
  0x55   :  { %2140 = vmatpush1.bf16.msra.mxu0 %v3139_v28  ;;  %2172 = vmatpush1.bf16.msra.mxu1 %v3143_v33  ;;  %v476_v13 = vld [vmem:[#allocation6 + $0x1f0] sm:$0xff]  ;;  %v3196_v17 = vpack.c.bf16 %v474_v9, %v470_v7  ;;  %v89_v25 = vld [vmem:[%s3541_s3] sm:$0xf] }
  0x56   :  { %243 = vmatprep.mubr.f32.mxu0 %v2962_v0  ;;  %356 = vmatprep.mubr.f32.mxu1 %v2962_v0  ;;  %v3200_v19 = vpack.c.bf16 %v476_v13, %v472_v12  ;;  %v3252_v27 = vrot.slane %v89_v25, %v93_v23  ;;  %v3254_v29 = vrot.slane %v89_v25, %v97_v26 }
  0x57   :  { %2142 = vmatprep.subr.bf16.mxu0 %v3147_v37  ;;  %2174 = vmatprep.subr.bf16.mxu1 %v3151_v41  ;;  %v3258_v49 = vrot.slane %v89_v25, %v105_v34  ;;  %v3261_v56 = vrot.slane %v89_v25, %v101_v52 }
  0x58   :  { %2011 = vmatmul.mubr.msk.f32.gmra.mrb[10].mxu0 %vm111_vm3, %v70_v45  ;;  %2021 = vmatmul.mubr.msk.f32.gmra.mrb[10].mxu1 %vm111_vm3, %v70_v45 }
  0x59   :  { %2144 = vmatpush1.bf16.msra.mxu0 %v3158_v46  ;;  %2176 = vmatpush1.bf16.msra.mxu1 %v3162_v50 }
  0x5a   :  { %249 = vmatprep.mubr.f32.mxu0 %v2962_v0  ;;  %362 = vmatprep.mubr.f32.mxu1 %v2962_v0 }
  0x5b   :  { %2146 = vmatprep.subr.bf16.mxu0 %v3166_v54  ;;  %2178 = vmatprep.subr.bf16.mxu1 %v3170_v59 }
  0x5c   :  { %2012 = vmatmul.mubr.msk.f32.gmra.mrb[12].mxu0 %vm111_vm3, %v71_v63  ;;  %2022 = vmatmul.mubr.msk.f32.gmra.mrb[12].mxu1 %vm111_vm3, %v71_v63 }
  0x5d   :  { %2148 = vmatpush1.bf16.msra.mxu0 %v3177_v1  ;;  %2180 = vmatpush1.bf16.msra.mxu1 %v3181_v6 }
  0x5e   :  { %255 = vmatprep.mubr.f32.mxu0 %v2962_v0  ;;  %368 = vmatprep.mubr.f32.mxu1 %v2962_v0 }
  0x5f   :  { %2150 = vmatprep.subr.bf16.mxu0 %v3185_v10  ;;  %2182 = vmatprep.subr.bf16.mxu1 %v3189_v14 }
  0x60   :  { %2013 = vmatmul.mubr.msk.f32.gmra.mrb[14].mxu0 %vm111_vm3, %v72_v16  ;;  %2023 = vmatmul.mubr.msk.f32.gmra.mrb[14].mxu1 %vm111_vm3, %v72_v16 }
  0x61   :  { %2152 = vmatpush1.bf16.msra.mxu0 %v3196_v17  ;;  %2184 = vmatpush1.bf16.msra.mxu1 %v3200_v19 }
  0x62   :  { %542 = vmatprep.mubr.f32.mxu0 %v2962_v0  ;;  %613 = vmatprep.mubr.f32.mxu1 %v2962_v0 }
  0x63   :  { %2186 = vmatprep.subr.bf16.mxu0 %v3055_v30  ;;  %2218 = vmatprep.subr.bf16.mxu1 %v3057_v31 }
  0x64   :  { %543 = vmatmul.mubr.f32.vlgmr.msra.gmra.mrb[0].mxu0 %v2962_v0  ;;  %614 = vmatmul.mubr.f32.vlgmr.msra.gmra.mrb[0].mxu1 %v2962_v0 }
  0x65   :  { %2188 = vmatpush1.bf16.msra.mxu0 %v3064_v36  ;;  %2220 = vmatpush1.bf16.msra.mxu1 %v3069_v39 }
  0x66   :  { %2190 = vmatprep.subr.bf16.mxu0 %v3072_v43  ;;  %2222 = vmatprep.subr.bf16.mxu1 %v3078_v48 }
  0x67   :  { %719 = vmatprep.mubr.f32.mxu0 %v2962_v0  ;;  %790 = vmatprep.mubr.f32.mxu1 %v2962_v0 }
  0x69   :  { %2192 = vmatpush1.bf16.msra.mxu0 %v3082_v51  ;;  %2224 = vmatpush1.bf16.msra.mxu1 %v3086_v55 }
  0x6a   :  { %2194 = vmatprep.subr.bf16.mxu0 %v3090_v58  ;;  %2226 = vmatprep.subr.bf16.mxu1 %v3094_v61 }
  0x6d   :  { %2196 = vmatpush1.bf16.msra.mxu0 %v3101_v2  ;;  %2228 = vmatpush1.bf16.msra.mxu1 %v3105_v5 }
  0x6e   :  { %2198 = vmatprep.subr.bf16.mxu0 %v3109_v8  ;;  %2230 = vmatprep.subr.bf16.mxu1 %v3113_v11 }
  0x71   :  { %2200 = vmatpush1.bf16.msra.mxu0 %v3120_v15  ;;  %2232 = vmatpush1.bf16.msra.mxu1 %v3124_v18 }
  0x72   :  { %2202 = vmatprep.subr.bf16.mxu0 %v3128_v21  ;;  %2234 = vmatprep.subr.bf16.mxu1 %v3132_v24 }
  0x75   :  { %2204 = vmatpush1.bf16.msra.mxu0 %v3139_v28  ;;  %2236 = vmatpush1.bf16.msra.mxu1 %v3143_v33 }
  0x76   :  { %2206 = vmatprep.subr.bf16.mxu0 %v3147_v37  ;;  %2238 = vmatprep.subr.bf16.mxu1 %v3151_v41 }
  0x79   :  { %2208 = vmatpush1.bf16.msra.mxu0 %v3158_v46  ;;  %2240 = vmatpush1.bf16.msra.mxu1 %v3162_v50 }
  0x7a   :  { %2210 = vmatprep.subr.bf16.mxu0 %v3166_v54  ;;  %2242 = vmatprep.subr.bf16.mxu1 %v3170_v59 }
  0x7d   :  { %2212 = vmatpush1.bf16.msra.mxu0 %v3177_v1  ;;  %2244 = vmatpush1.bf16.msra.mxu1 %v3181_v6 }
  0x7e   :  { %2214 = vmatprep.subr.bf16.mxu0 %v3185_v10  ;;  %2246 = vmatprep.subr.bf16.mxu1 %v3189_v14 }
  0x81   :  { %2216 = vmatpush1.bf16.msra.mxu0 %v3196_v17  ;;  %2248 = vmatpush1.bf16.msra.mxu1 %v3200_v19 }
  0x82   :  { %2250 = vmatprep.subr.bf16.mxu0 %v3055_v30  ;;  %2282 = vmatprep.subr.bf16.mxu1 %v3057_v31 }
 0x137   :  { %v544_v32 = vpop.f32.mrb[0].mxu0  ;;  %v615_v38 = vpop.f32.mrb[0].mxu1 }
 0x138   :  { %v2657_v35 = vadd.f32 %v544_v32, %v3252_v27  ;;  %v546_v40 = vpop.f32.mrb[1].mxu0  ;;  %v617_v44 = vpop.f32.mrb[1].mxu1  ;;  %v2673_v60 = vadd.f32 %v615_v38, %v3261_v56 }
 0x139   :  { %v2658_v42 = vadd.f32 %v546_v40, %v3254_v29  ;;  %v2674_v53 = vadd.f32 %v617_v44, %v3258_v49 }
 0x13a   :  { %v2024_v45 = vmul.f32 -1.442695, %v2657_v35 }
 0x13b   :  { %v2025_v47 = vmul.f32 -1.442695, %v2658_v42  ;;  %v2026_v57 = vmul.f32 -1.442695, %v2674_v53 }
 0x13c   :  { %2733 = vpow2.f32 %v2024_v45 }
 0x13d   :  { %2735 = vpow2.f32 %v2025_v47 }
 0x13e   :  { %2737 = vpow2.f32 %v2026_v57 }
 0x13f   :  { %2739 = vtanh.f32 %v2673_v60 }
 0x146   :  { %v2734_v62 = vpop.eup %2733 }
 0x147   :  { %v2736_v63 = vpop.eup %2735  ;;  %v630_v3 = vadd.f32 1.0, %v2734_v62 }
 0x148   :  { %v631_v4 = vadd.f32 1.0, %v2736_v63  ;;  %v2738_v7 = vpop.eup %2737 }
 0x149   :  { %2741 = vrcp.f32 %v630_v3  ;;  %v2740_v9 = vpop.eup %2739  ;;  %v640_v20 = vadd.f32 1.0, %v2738_v7 }
 0x14a   :  { %2743 = vrcp.f32 %v631_v4 }
 0x14b   :  { %2745 = vrcp.f32 %v640_v20 }
 0x153   :  { %v2742_v12 = vpop.eup %2741 }
 0x154   :  { %v2744_v13 = vpop.eup %2743  ;;  %v644_v16 = vmul.f32 %v2742_v12, %v2740_v9 }
 0x155   :  { %v643_v22 = vmul.f32 0.0, %v2744_v13  ;;  %v2746_v25 = vpop.eup %2745 }
 0x157   :  { %v3264_v23 = vadd.f32 %v644_v16, %v643_v22 }
 0x159   :  { %2747 = vtanh.f32 %v3264_v23 }
 0x163   :  { %v2748_v26 = vpop.eup %2747 }
 0x164   :  { %v647_v32 = vmul.f32 %v2748_v26, %v2746_v25 }
 0x166   :  { %720 = vmatmul.mubr.f32.vlgmr.msra.gmra.mrb[2].mxu0 %v647_v32  ;;  %791 = vmatmul.mubr.f32.vlgmr.msra.gmra.mrb[2].mxu1 %v647_v32 }
 0x167   :  { %2252 = vmatpush1.bf16.msra.mxu0 %v3064_v36  ;;  %2284 = vmatpush1.bf16.msra.mxu1 %v3069_v39 }
 0x168   :  { %2254 = vmatprep.subr.bf16.mxu0 %v3072_v43  ;;  %2286 = vmatprep.subr.bf16.mxu1 %v3078_v48 }
 0x169   :  { %896 = vmatprep.mubr.f32.mxu0 %v2962_v0  ;;  %967 = vmatprep.mubr.f32.mxu1 %v2962_v0 }
 0x16b   :  { %2256 = vmatpush1.bf16.msra.mxu0 %v3082_v51  ;;  %2288 = vmatpush1.bf16.msra.mxu1 %v3086_v55 }
 0x16c   :  { %2258 = vmatprep.subr.bf16.mxu0 %v3090_v58  ;;  %2290 = vmatprep.subr.bf16.mxu1 %v3094_v61 }
 0x16f   :  { %2260 = vmatpush1.bf16.msra.mxu0 %v3101_v2  ;;  %2292 = vmatpush1.bf16.msra.mxu1 %v3105_v5 }
 0x170   :  { %2262 = vmatprep.subr.bf16.mxu0 %v3109_v8  ;;  %2294 = vmatprep.subr.bf16.mxu1 %v3113_v11 }
 0x173   :  { %2264 = vmatpush1.bf16.msra.mxu0 %v3120_v15  ;;  %2296 = vmatpush1.bf16.msra.mxu1 %v3124_v18 }
 0x174   :  { %2266 = vmatprep.subr.bf16.mxu0 %v3128_v21  ;;  %2298 = vmatprep.subr.bf16.mxu1 %v3132_v24 }
 0x177   :  { %2268 = vmatpush1.bf16.msra.mxu0 %v3139_v28  ;;  %2300 = vmatpush1.bf16.msra.mxu1 %v3143_v33 }
 0x178   :  { %2270 = vmatprep.subr.bf16.mxu0 %v3147_v37  ;;  %2302 = vmatprep.subr.bf16.mxu1 %v3151_v41 }
 0x17b   :  { %2272 = vmatpush1.bf16.msra.mxu0 %v3158_v46  ;;  %2304 = vmatpush1.bf16.msra.mxu1 %v3162_v50 }
 0x17c   :  { %2274 = vmatprep.subr.bf16.mxu0 %v3166_v54  ;;  %2306 = vmatprep.subr.bf16.mxu1 %v3170_v59 }
 0x17f   :  { %2276 = vmatpush1.bf16.msra.mxu0 %v3177_v1  ;;  %2308 = vmatpush1.bf16.msra.mxu1 %v3181_v6 }
 0x180   :  { %2278 = vmatprep.subr.bf16.mxu0 %v3185_v10  ;;  %2310 = vmatprep.subr.bf16.mxu1 %v3189_v14 }
 0x183   :  { %2280 = vmatpush1.bf16.msra.mxu0 %v3196_v17  ;;  %2312 = vmatpush1.bf16.msra.mxu1 %v3200_v19 }
 0x184   :  { %2314 = vmatprep.subr.bf16.mxu0 %v3055_v30  ;;  %2346 = vmatprep.subr.bf16.mxu1 %v3057_v31 }
 0x239   :  { %v721_v34 = vpop.f32.mrb[2].mxu0  ;;  %v792_v35 = vpop.f32.mrb[2].mxu1 }
 0x23a   :  { %v2659_v38 = vadd.f32 %v721_v34, %v3252_v27  ;;  %v723_v40 = vpop.f32.mrb[3].mxu0  ;;  %v794_v42 = vpop.f32.mrb[3].mxu1  ;;  %v2675_v57 = vadd.f32 %v792_v35, %v3261_v56 }
 0x23b   :  { %v2660_v44 = vadd.f32 %v723_v40, %v3254_v29  ;;  %v2676_v52 = vadd.f32 %v794_v42, %v3258_v49 }
 0x23c   :  { %v2027_v45 = vmul.f32 -1.442695, %v2659_v38 }
 0x23d   :  { %v2028_v47 = vmul.f32 -1.442695, %v2660_v44  ;;  %v2029_v53 = vmul.f32 -1.442695, %v2676_v52 }
 0x23e   :  { %2749 = vpow2.f32 %v2027_v45 }
 0x23f   :  { %2751 = vpow2.f32 %v2028_v47 }
 0x240   :  { %2753 = vpow2.f32 %v2029_v53 }
 0x241   :  { %2755 = vtanh.f32 %v2675_v57 }
 0x248   :  { %v2750_v60 = vpop.eup %2749 }
 0x249   :  { %v2752_v62 = vpop.eup %2751  ;;  %v807_v63 = vadd.f32 1.0, %v2750_v60 }
 0x24a   :  { %v808_v3 = vadd.f32 1.0, %v2752_v62  ;;  %v2754_v4 = vpop.eup %2753 }
 0x24b   :  { %2757 = vrcp.f32 %v807_v63  ;;  %v2756_v7 = vpop.eup %2755  ;;  %v817_v16 = vadd.f32 1.0, %v2754_v4 }
 0x24c   :  { %2759 = vrcp.f32 %v808_v3 }
 0x24d   :  { %2761 = vrcp.f32 %v817_v16 }
 0x255   :  { %v2758_v9 = vpop.eup %2757 }
 0x256   :  { %v2760_v12 = vpop.eup %2759  ;;  %v821_v13 = vmul.f32 %v2758_v9, %v2756_v7 }
 0x257   :  { %v820_v20 = vmul.f32 %v2760_v12, %v3264_v23  ;;  %v2762_v25 = vpop.eup %2761 }
 0x259   :  { %v3306_v22 = vadd.f32 %v821_v13, %v820_v20 }
 0x25b   :  { %2763 = vtanh.f32 %v3306_v22 }
 0x265   :  { %v2764_v26 = vpop.eup %2763 }
 0x266   :  { %v824_v32 = vmul.f32 %v2764_v26, %v2762_v25 }
 0x268   :  { %897 = vmatmul.mubr.f32.vlgmr.msra.gmra.mrb[4].mxu0 %v824_v32  ;;  %968 = vmatmul.mubr.f32.vlgmr.msra.gmra.mrb[4].mxu1 %v824_v32 }
 0x269   :  { %2316 = vmatpush1.bf16.msra.mxu0 %v3064_v36  ;;  %2348 = vmatpush1.bf16.msra.mxu1 %v3069_v39 }
 0x26a   :  { %2318 = vmatprep.subr.bf16.mxu0 %v3072_v43  ;;  %2350 = vmatprep.subr.bf16.mxu1 %v3078_v48 }
 0x26b   :  { %1073 = vmatprep.mubr.f32.mxu0 %v2962_v0  ;;  %1144 = vmatprep.mubr.f32.mxu1 %v2962_v0 }
 0x26d   :  { %2320 = vmatpush1.bf16.msra.mxu0 %v3082_v51  ;;  %2352 = vmatpush1.bf16.msra.mxu1 %v3086_v55 }
 0x26e   :  { %2322 = vmatprep.subr.bf16.mxu0 %v3090_v58  ;;  %2354 = vmatprep.subr.bf16.mxu1 %v3094_v61 }
 0x271   :  { %2324 = vmatpush1.bf16.msra.mxu0 %v3101_v2  ;;  %2356 = vmatpush1.bf16.msra.mxu1 %v3105_v5 }
 0x272   :  { %2326 = vmatprep.subr.bf16.mxu0 %v3109_v8  ;;  %2358 = vmatprep.subr.bf16.mxu1 %v3113_v11 }
 0x275   :  { %2328 = vmatpush1.bf16.msra.mxu0 %v3120_v15  ;;  %2360 = vmatpush1.bf16.msra.mxu1 %v3124_v18 }
 0x276   :  { %2330 = vmatprep.subr.bf16.mxu0 %v3128_v21  ;;  %2362 = vmatprep.subr.bf16.mxu1 %v3132_v24 }
 0x279   :  { %2332 = vmatpush1.bf16.msra.mxu0 %v3139_v28  ;;  %2364 = vmatpush1.bf16.msra.mxu1 %v3143_v33 }
 0x27a   :  { %2334 = vmatprep.subr.bf16.mxu0 %v3147_v37  ;;  %2366 = vmatprep.subr.bf16.mxu1 %v3151_v41 }
 0x27d   :  { %2336 = vmatpush1.bf16.msra.mxu0 %v3158_v46  ;;  %2368 = vmatpush1.bf16.msra.mxu1 %v3162_v50 }
 0x27e   :  { %2338 = vmatprep.subr.bf16.mxu0 %v3166_v54  ;;  %2370 = vmatprep.subr.bf16.mxu1 %v3170_v59 }
 0x281   :  { %2340 = vmatpush1.bf16.msra.mxu0 %v3177_v1  ;;  %2372 = vmatpush1.bf16.msra.mxu1 %v3181_v6 }
 0x282   :  { %2342 = vmatprep.subr.bf16.mxu0 %v3185_v10  ;;  %2374 = vmatprep.subr.bf16.mxu1 %v3189_v14 }
 0x285   :  { %2344 = vmatpush1.bf16.msra.mxu0 %v3196_v17  ;;  %2376 = vmatpush1.bf16.msra.mxu1 %v3200_v19 }
 0x286   :  { %2378 = vmatprep.subr.bf16.mxu0 %v3055_v30  ;;  %2410 = vmatprep.subr.bf16.mxu1 %v3057_v31 }
 0x33b   :  { %v898_v23 = vpop.f32.mrb[4].mxu0  ;;  %v969_v34 = vpop.f32.mrb[4].mxu1 }
 0x33c   :  { %v2661_v35 = vadd.f32 %v898_v23, %v3252_v27  ;;  %v900_v38 = vpop.f32.mrb[5].mxu0  ;;  %v971_v40 = vpop.f32.mrb[5].mxu1  ;;  %v2677_v53 = vadd.f32 %v969_v34, %v3261_v56 }
 0x33d   :  { %v2662_v42 = vadd.f32 %v900_v38, %v3254_v29  ;;  %v2678_v47 = vadd.f32 %v971_v40, %v3258_v49 }
 0x33e   :  { %v2030_v44 = vmul.f32 -1.442695, %v2661_v35 }
 0x33f   :  { %v2031_v45 = vmul.f32 -1.442695, %v2662_v42  ;;  %v2032_v52 = vmul.f32 -1.442695, %v2678_v47 }
 0x340   :  { %2765 = vpow2.f32 %v2030_v44 }
 0x341   :  { %2767 = vpow2.f32 %v2031_v45 }
 0x342   :  { %2769 = vpow2.f32 %v2032_v52 }
 0x343   :  { %2771 = vtanh.f32 %v2677_v53 }
 0x34a   :  { %v2766_v57 = vpop.eup %2765 }
 0x34b   :  { %v2768_v60 = vpop.eup %2767  ;;  %v984_v62 = vadd.f32 1.0, %v2766_v57 }
 0x34c   :  { %v985_v63 = vadd.f32 1.0, %v2768_v60  ;;  %v2770_v3 = vpop.eup %2769 }
 0x34d   :  { %2773 = vrcp.f32 %v984_v62  ;;  %v2772_v4 = vpop.eup %2771  ;;  %v994_v13 = vadd.f32 1.0, %v2770_v3 }
 0x34e   :  { %2775 = vrcp.f32 %v985_v63 }
 0x34f   :  { %2777 = vrcp.f32 %v994_v13 }
 0x357   :  { %v2774_v7 = vpop.eup %2773 }
 0x358   :  { %v2776_v9 = vpop.eup %2775  ;;  %v998_v12 = vmul.f32 %v2774_v7, %v2772_v4 }
 0x359   :  { %v997_v16 = vmul.f32 %v2776_v9, %v3306_v22  ;;  %v2778_v25 = vpop.eup %2777 }
 0x35b   :  { %v3348_v20 = vadd.f32 %v998_v12, %v997_v16 }
 0x35d   :  { %2779 = vtanh.f32 %v3348_v20 }
 0x367   :  { %v2780_v26 = vpop.eup %2779 }
 0x368   :  { %v1001_v32 = vmul.f32 %v2780_v26, %v2778_v25 }
 0x36a   :  { %1074 = vmatmul.mubr.f32.vlgmr.msra.gmra.mrb[6].mxu0 %v1001_v32  ;;  %1145 = vmatmul.mubr.f32.vlgmr.msra.gmra.mrb[6].mxu1 %v1001_v32 }
 0x36b   :  { %2380 = vmatpush1.bf16.msra.mxu0 %v3064_v36  ;;  %2412 = vmatpush1.bf16.msra.mxu1 %v3069_v39 }
 0x36c   :  { %2382 = vmatprep.subr.bf16.mxu0 %v3072_v43  ;;  %2414 = vmatprep.subr.bf16.mxu1 %v3078_v48 }
 0x36d   :  { %1250 = vmatprep.mubr.f32.mxu0 %v2962_v0  ;;  %1321 = vmatprep.mubr.f32.mxu1 %v2962_v0 }
 0x36f   :  { %2384 = vmatpush1.bf16.msra.mxu0 %v3082_v51  ;;  %2416 = vmatpush1.bf16.msra.mxu1 %v3086_v55 }
 0x370   :  { %2386 = vmatprep.subr.bf16.mxu0 %v3090_v58  ;;  %2418 = vmatprep.subr.bf16.mxu1 %v3094_v61 }
 0x373   :  { %2388 = vmatpush1.bf16.msra.mxu0 %v3101_v2  ;;  %2420 = vmatpush1.bf16.msra.mxu1 %v3105_v5 }
 0x374   :  { %2390 = vmatprep.subr.bf16.mxu0 %v3109_v8  ;;  %2422 = vmatprep.subr.bf16.mxu1 %v3113_v11 }
 0x377   :  { %2392 = vmatpush1.bf16.msra.mxu0 %v3120_v15  ;;  %2424 = vmatpush1.bf16.msra.mxu1 %v3124_v18 }
 0x378   :  { %2394 = vmatprep.subr.bf16.mxu0 %v3128_v21  ;;  %2426 = vmatprep.subr.bf16.mxu1 %v3132_v24 }
 0x37b   :  { %2396 = vmatpush1.bf16.msra.mxu0 %v3139_v28  ;;  %2428 = vmatpush1.bf16.msra.mxu1 %v3143_v33 }
 0x37c   :  { %2398 = vmatprep.subr.bf16.mxu0 %v3147_v37  ;;  %2430 = vmatprep.subr.bf16.mxu1 %v3151_v41 }
 0x37f   :  { %2400 = vmatpush1.bf16.msra.mxu0 %v3158_v46  ;;  %2432 = vmatpush1.bf16.msra.mxu1 %v3162_v50 }
 0x380   :  { %2402 = vmatprep.subr.bf16.mxu0 %v3166_v54  ;;  %2434 = vmatprep.subr.bf16.mxu1 %v3170_v59 }
 0x383   :  { %2404 = vmatpush1.bf16.msra.mxu0 %v3177_v1  ;;  %2436 = vmatpush1.bf16.msra.mxu1 %v3181_v6 }
 0x384   :  { %2406 = vmatprep.subr.bf16.mxu0 %v3185_v10  ;;  %2438 = vmatprep.subr.bf16.mxu1 %v3189_v14 }
 0x387   :  { %2408 = vmatpush1.bf16.msra.mxu0 %v3196_v17  ;;  %2440 = vmatpush1.bf16.msra.mxu1 %v3200_v19 }
 0x388   :  { %2442 = vmatprep.subr.bf16.mxu0 %v3055_v30  ;;  %2474 = vmatprep.subr.bf16.mxu1 %v3057_v31 }
 0x43d   :  { %v1075_v22 = vpop.f32.mrb[6].mxu0  ;;  %v1146_v23 = vpop.f32.mrb[6].mxu1 }
 0x43e   :  { %v2663_v34 = vadd.f32 %v1075_v22, %v3252_v27  ;;  %v1077_v35 = vpop.f32.mrb[7].mxu0  ;;  %v1148_v38 = vpop.f32.mrb[7].mxu1  ;;  %v2679_v52 = vadd.f32 %v1146_v23, %v3261_v56 }
 0x43f   :  { %v2664_v40 = vadd.f32 %v1077_v35, %v3254_v29  ;;  %v2680_v45 = vadd.f32 %v1148_v38, %v3258_v49 }
 0x440   :  { %v2033_v42 = vmul.f32 -1.442695, %v2663_v34 }
 0x441   :  { %v2034_v44 = vmul.f32 -1.442695, %v2664_v40  ;;  %v2035_v47 = vmul.f32 -1.442695, %v2680_v45 }
 0x442   :  { %2781 = vpow2.f32 %v2033_v42 }
 0x443   :  { %2783 = vpow2.f32 %v2034_v44 }
 0x444   :  { %2785 = vpow2.f32 %v2035_v47 }
 0x445   :  { %2787 = vtanh.f32 %v2679_v52 }
 0x44c   :  { %v2782_v53 = vpop.eup %2781 }
 0x44d   :  { %v2784_v57 = vpop.eup %2783  ;;  %v1161_v60 = vadd.f32 1.0, %v2782_v53 }
 0x44e   :  { %v1162_v62 = vadd.f32 1.0, %v2784_v57  ;;  %v2786_v63 = vpop.eup %2785 }
 0x44f   :  { %2789 = vrcp.f32 %v1161_v60  ;;  %v2788_v3 = vpop.eup %2787  ;;  %v1171_v12 = vadd.f32 1.0, %v2786_v63 }
 0x450   :  { %2791 = vrcp.f32 %v1162_v62 }
 0x451   :  { %2793 = vrcp.f32 %v1171_v12 }
 0x459   :  { %v2790_v4 = vpop.eup %2789 }
 0x45a   :  { %v2792_v7 = vpop.eup %2791  ;;  %v1175_v9 = vmul.f32 %v2790_v4, %v2788_v3 }
 0x45b   :  { %v1174_v13 = vmul.f32 %v2792_v7, %v3348_v20  ;;  %v2794_v25 = vpop.eup %2793 }
 0x45d   :  { %v3390_v16 = vadd.f32 %v1175_v9, %v1174_v13 }
 0x45f   :  { %2795 = vtanh.f32 %v3390_v16 }
 0x469   :  { %v2796_v26 = vpop.eup %2795 }
 0x46a   :  { %v1178_v32 = vmul.f32 %v2796_v26, %v2794_v25 }
 0x46c   :  { %1251 = vmatmul.mubr.f32.vlgmr.msra.gmra.mrb[8].mxu0 %v1178_v32  ;;  %1322 = vmatmul.mubr.f32.vlgmr.msra.gmra.mrb[8].mxu1 %v1178_v32 }
 0x46d   :  { %2444 = vmatpush1.bf16.msra.mxu0 %v3064_v36  ;;  %2476 = vmatpush1.bf16.msra.mxu1 %v3069_v39 }
 0x46e   :  { %2446 = vmatprep.subr.bf16.mxu0 %v3072_v43  ;;  %2478 = vmatprep.subr.bf16.mxu1 %v3078_v48 }
 0x46f   :  { %1427 = vmatprep.mubr.f32.mxu0 %v2962_v0  ;;  %1498 = vmatprep.mubr.f32.mxu1 %v2962_v0 }
 0x471   :  { %2448 = vmatpush1.bf16.msra.mxu0 %v3082_v51  ;;  %2480 = vmatpush1.bf16.msra.mxu1 %v3086_v55 }
 0x472   :  { %2450 = vmatprep.subr.bf16.mxu0 %v3090_v58  ;;  %2482 = vmatprep.subr.bf16.mxu1 %v3094_v61 }
 0x475   :  { %2452 = vmatpush1.bf16.msra.mxu0 %v3101_v2  ;;  %2484 = vmatpush1.bf16.msra.mxu1 %v3105_v5 }
 0x476   :  { %2454 = vmatprep.subr.bf16.mxu0 %v3109_v8  ;;  %2486 = vmatprep.subr.bf16.mxu1 %v3113_v11 }
 0x479   :  { %2456 = vmatpush1.bf16.msra.mxu0 %v3120_v15  ;;  %2488 = vmatpush1.bf16.msra.mxu1 %v3124_v18 }
 0x47a   :  { %2458 = vmatprep.subr.bf16.mxu0 %v3128_v21  ;;  %2490 = vmatprep.subr.bf16.mxu1 %v3132_v24 }
 0x47d   :  { %2460 = vmatpush1.bf16.msra.mxu0 %v3139_v28  ;;  %2492 = vmatpush1.bf16.msra.mxu1 %v3143_v33 }
 0x47e   :  { %2462 = vmatprep.subr.bf16.mxu0 %v3147_v37  ;;  %2494 = vmatprep.subr.bf16.mxu1 %v3151_v41 }
 0x481   :  { %2464 = vmatpush1.bf16.msra.mxu0 %v3158_v46  ;;  %2496 = vmatpush1.bf16.msra.mxu1 %v3162_v50 }
 0x482   :  { %2466 = vmatprep.subr.bf16.mxu0 %v3166_v54  ;;  %2498 = vmatprep.subr.bf16.mxu1 %v3170_v59 }
 0x485   :  { %2468 = vmatpush1.bf16.msra.mxu0 %v3177_v1  ;;  %2500 = vmatpush1.bf16.msra.mxu1 %v3181_v6 }
 0x486   :  { %2470 = vmatprep.subr.bf16.mxu0 %v3185_v10  ;;  %2502 = vmatprep.subr.bf16.mxu1 %v3189_v14 }
 0x489   :  { %2472 = vmatpush1.bf16.msra.mxu0 %v3196_v17  ;;  %2504 = vmatpush1.bf16.msra.mxu1 %v3200_v19 }
 0x48a   :  { %2506 = vmatprep.subr.bf16.mxu0 %v3055_v30  ;;  %2538 = vmatprep.subr.bf16.mxu1 %v3057_v31 }
 0x53f   :  { %v1252_v20 = vpop.f32.mrb[8].mxu0  ;;  %v1323_v22 = vpop.f32.mrb[8].mxu1 }
 0x540   :  { %v2665_v23 = vadd.f32 %v1252_v20, %v3252_v27  ;;  %v1254_v34 = vpop.f32.mrb[9].mxu0  ;;  %v1325_v35 = vpop.f32.mrb[9].mxu1  ;;  %v2681_v47 = vadd.f32 %v1323_v22, %v3261_v56 }
 0x541   :  { %v2666_v38 = vadd.f32 %v1254_v34, %v3254_v29  ;;  %v2682_v44 = vadd.f32 %v1325_v35, %v3258_v49 }
 0x542   :  { %v2036_v40 = vmul.f32 -1.442695, %v2665_v23 }
 0x543   :  { %v2037_v42 = vmul.f32 -1.442695, %v2666_v38  ;;  %v2038_v45 = vmul.f32 -1.442695, %v2682_v44 }
 0x544   :  { %2797 = vpow2.f32 %v2036_v40 }
 0x545   :  { %2799 = vpow2.f32 %v2037_v42 }
 0x546   :  { %2801 = vpow2.f32 %v2038_v45 }
 0x547   :  { %2803 = vtanh.f32 %v2681_v47 }
 0x54e   :  { %v2798_v52 = vpop.eup %2797 }
 0x54f   :  { %v2800_v53 = vpop.eup %2799  ;;  %v1338_v57 = vadd.f32 1.0, %v2798_v52 }
 0x550   :  { %v1339_v60 = vadd.f32 1.0, %v2800_v53  ;;  %v2802_v62 = vpop.eup %2801 }
 0x551   :  { %2805 = vrcp.f32 %v1338_v57  ;;  %v2804_v63 = vpop.eup %2803  ;;  %v1348_v9 = vadd.f32 1.0, %v2802_v62 }
 0x552   :  { %2807 = vrcp.f32 %v1339_v60 }
 0x553   :  { %2809 = vrcp.f32 %v1348_v9 }
 0x55b   :  { %v2806_v3 = vpop.eup %2805 }
 0x55c   :  { %v2808_v4 = vpop.eup %2807  ;;  %v1352_v7 = vmul.f32 %v2806_v3, %v2804_v63 }
 0x55d   :  { %v1351_v12 = vmul.f32 %v2808_v4, %v3390_v16  ;;  %v2810_v25 = vpop.eup %2809 }
 0x55f   :  { %v3432_v13 = vadd.f32 %v1352_v7, %v1351_v12 }
 0x561   :  { %2811 = vtanh.f32 %v3432_v13 }
 0x56b   :  { %v2812_v26 = vpop.eup %2811 }
 0x56c   :  { %v1355_v32 = vmul.f32 %v2812_v26, %v2810_v25  ;;  %v1890_v26 = vld [vmem:[#allocation8 + $0x18] sm:$0xff] }
 0x56e   :  { %1428 = vmatmul.mubr.f32.vlgmr.msra.gmra.mrb[10].mxu0 %v1355_v32  ;;  %1499 = vmatmul.mubr.f32.vlgmr.msra.gmra.mrb[10].mxu1 %v1355_v32 }
 0x56f   :  { %2508 = vmatpush1.bf16.msra.mxu0 %v3064_v36  ;;  %2540 = vmatpush1.bf16.msra.mxu1 %v3069_v39 }
 0x570   :  { %2510 = vmatprep.subr.bf16.mxu0 %v3072_v43  ;;  %2542 = vmatprep.subr.bf16.mxu1 %v3078_v48 }
 0x571   :  { %1604 = vmatprep.mubr.f32.mxu0 %v2962_v0  ;;  %1675 = vmatprep.mubr.f32.mxu1 %v2962_v0 }
 0x573   :  { %2512 = vmatpush1.bf16.msra.mxu0 %v3082_v51  ;;  %2544 = vmatpush1.bf16.msra.mxu1 %v3086_v55 }
 0x574   :  { %2514 = vmatprep.subr.bf16.mxu0 %v3090_v58  ;;  %2546 = vmatprep.subr.bf16.mxu1 %v3094_v61 }
 0x577   :  { %2516 = vmatpush1.bf16.msra.mxu0 %v3101_v2  ;;  %2548 = vmatpush1.bf16.msra.mxu1 %v3105_v5 }
 0x578   :  { %2518 = vmatprep.subr.bf16.mxu0 %v3109_v8  ;;  %2550 = vmatprep.subr.bf16.mxu1 %v3113_v11 }
 0x57b   :  { %2520 = vmatpush1.bf16.msra.mxu0 %v3120_v15  ;;  %2552 = vmatpush1.bf16.msra.mxu1 %v3124_v18 }
 0x57c   :  { %2522 = vmatprep.subr.bf16.mxu0 %v3128_v21  ;;  %2554 = vmatprep.subr.bf16.mxu1 %v3132_v24 }
 0x57f   :  { %2524 = vmatpush1.bf16.msra.mxu0 %v3139_v28  ;;  %2556 = vmatpush1.bf16.msra.mxu1 %v3143_v33 }
 0x580   :  { %2526 = vmatprep.subr.bf16.mxu0 %v3147_v37  ;;  %2558 = vmatprep.subr.bf16.mxu1 %v3151_v41 }
 0x583   :  { %2528 = vmatpush1.bf16.msra.mxu0 %v3158_v46  ;;  %2560 = vmatpush1.bf16.msra.mxu1 %v3162_v50 }
 0x584   :  { %2530 = vmatprep.subr.bf16.mxu0 %v3166_v54  ;;  %2562 = vmatprep.subr.bf16.mxu1 %v3170_v59 }
 0x587   :  { %2532 = vmatpush1.bf16.msra.mxu0 %v3177_v1  ;;  %2564 = vmatpush1.bf16.msra.mxu1 %v3181_v6 }
 0x588   :  { %2534 = vmatprep.subr.bf16.mxu0 %v3185_v10  ;;  %2566 = vmatprep.subr.bf16.mxu1 %v3189_v14 }
 0x58b   :  { %2536 = vmatpush1.bf16.msra.mxu0 %v3196_v17  ;;  %2568 = vmatpush1.bf16.msra.mxu1 %v3200_v19 }
 0x58c   :  { %2570 = vmatprep.subr.bf16.mxu0 %v3055_v30  ;;  %2602 = vmatprep.subr.bf16.mxu1 %v3057_v31 }
 0x641   :  { %v1429_v16 = vpop.f32.mrb[10].mxu0  ;;  %v1500_v20 = vpop.f32.mrb[10].mxu1 }
 0x642   :  { %v2667_v22 = vadd.f32 %v1429_v16, %v3252_v27  ;;  %v1431_v23 = vpop.f32.mrb[11].mxu0  ;;  %v1502_v34 = vpop.f32.mrb[11].mxu1  ;;  %v2683_v45 = vadd.f32 %v1500_v20, %v3261_v56  ;;  %v1891_v16 = vld [vmem:[#allocation8 + $0x20] sm:$0xff]  ;;  %v1892_v20 = vld [vmem:[#allocation8 + $0x28] sm:$0xff] }
 0x643   :  { %v2668_v35 = vadd.f32 %v1431_v23, %v3254_v29  ;;  %v2684_v42 = vadd.f32 %v1502_v34, %v3258_v49  ;;  %v1893_v23 = vld [vmem:[#allocation8 + $0x30] sm:$0xff]  ;;  %v1894_v34 = vld [vmem:[#allocation8 + $0x38] sm:$0xff] }
 0x644   :  { %v2039_v38 = vmul.f32 -1.442695, %v2667_v22  ;;  %v2640_v22 = vpack.c.bf16 %v1892_v20, %v1891_v16 }
 0x645   :  { %v2040_v40 = vmul.f32 -1.442695, %v2668_v35  ;;  %v2041_v44 = vmul.f32 -1.442695, %v2684_v42  ;;  %v2643_v35 = vpack.c.bf16 %v1894_v34, %v1893_v23 }
 0x646   :  { %2813 = vpow2.f32 %v2039_v38  ;;  %v1895_v38 = vld [vmem:[#allocation8 + $0x40] sm:$0xff] }
 0x647   :  { %2815 = vpow2.f32 %v2040_v40  ;;  %v1896_v40 = vld [vmem:[#allocation8 + $0x48] sm:$0xff] }
 0x648   :  { %2817 = vpow2.f32 %v2041_v44  ;;  %v2646_v42 = vpack.c.bf16 %v1896_v40, %v1895_v38  ;;  %v1897_v44 = vld [vmem:[#allocation8 + $0x50] sm:$0xff] }
 0x649   :  { %2819 = vtanh.f32 %v2683_v45  ;;  %v1898_v45 = vld [vmem:[#allocation8 + $0x58] sm:$0xff] }
 0x650   :  { %v2814_v30 = vpop.eup %2813 }
 0x651   :  { %v2816_v47 = vpop.eup %2815  ;;  %v1515_v31 = vadd.f32 1.0, %v2814_v30  ;;  %v1899_v30 = vld [vmem:[#allocation8 + $0x60] sm:$0xff] }
 0x652   :  { %v1516_v52 = vadd.f32 1.0, %v2816_v47  ;;  %v2818_v53 = vpop.eup %2817  ;;  %v2649_v47 = vpack.c.bf16 %v1898_v45, %v1897_v44 }
 0x653   :  { %2821 = vrcp.f32 %v1515_v31  ;;  %v2820_v57 = vpop.eup %2819  ;;  %v1525_v3 = vadd.f32 1.0, %v2818_v53  ;;  %v1900_v31 = vld [vmem:[#allocation8 + $0x68] sm:$0xff]  ;;  %v1901_v53 = vld [vmem:[#allocation8 + $0x70] sm:$0xff] }
 0x654   :  { %2823 = vrcp.f32 %v1516_v52  ;;  %v2652_v52 = vpack.c.bf16 %v1900_v31, %v1899_v30 }
 0x655   :  { %2825 = vrcp.f32 %v1525_v3 }
 0x65d   :  { %v2822_v60 = vpop.eup %2821 }
 0x65e   :  { %v2824_v62 = vpop.eup %2823  ;;  %v1529_v63 = vmul.f32 %v2822_v60, %v2820_v57  ;;  %v1902_v57 = vld [vmem:[#allocation8 + $0x78] sm:$0xff] }
 0x65f   :  { %v1528_v4 = vmul.f32 %v2824_v62, %v3432_v13  ;;  %v2826_v9 = vpop.eup %2825  ;;  %v1889_v13 = vld [vmem:[#allocation8 + $0x10] sm:$0xff]  ;;  %v2655_v60 = vpack.c.bf16 %v1902_v57, %v1901_v53 }
 0x660   :  { %v2637_v32 = vpack.c.bf16 %v1890_v26, %v1889_v13 }
 0x661   :  { %v3474_v7 = vadd.f32 %v1529_v63, %v1528_v4 }
 0x663   :  { %2827 = vtanh.f32 %v3474_v7 }
 0x66d   :  { %v2828_v12 = vpop.eup %2827 }
 0x66e   :  { %v1532_v25 = vmul.f32 %v2828_v12, %v2826_v9 }
 0x670   :  { %1605 = vmatmul.mubr.f32.vlgmr.msra.gmra.mrb[12].mxu0 %v1532_v25  ;;  %1676 = vmatmul.mubr.f32.vlgmr.msra.gmra.mrb[12].mxu1 %v1532_v25 }
 0x671   :  { %2572 = vmatpush1.bf16.msra.mxu0 %v3064_v36  ;;  %2604 = vmatpush1.bf16.msra.mxu1 %v3069_v39 }
 0x672   :  { %2574 = vmatprep.subr.bf16.mxu0 %v3072_v43  ;;  %2606 = vmatprep.subr.bf16.mxu1 %v3078_v48 }
 0x673   :  { %1781 = vmatprep.mubr.f32.mxu0 %v2962_v0  ;;  %1852 = vmatprep.mubr.f32.mxu1 %v2962_v0 }
 0x675   :  { %2576 = vmatpush1.bf16.msra.mxu0 %v3082_v51  ;;  %2608 = vmatpush1.bf16.msra.mxu1 %v3086_v55 }
 0x676   :  { %2578 = vmatprep.subr.bf16.mxu0 %v3090_v58  ;;  %2610 = vmatprep.subr.bf16.mxu1 %v3094_v61 }
 0x679   :  { %2580 = vmatpush1.bf16.msra.mxu0 %v3101_v2  ;;  %2612 = vmatpush1.bf16.msra.mxu1 %v3105_v5 }
 0x67a   :  { %2582 = vmatprep.subr.bf16.mxu0 %v3109_v8  ;;  %2614 = vmatprep.subr.bf16.mxu1 %v3113_v11 }
 0x67d   :  { %2584 = vmatpush1.bf16.msra.mxu0 %v3120_v15  ;;  %2616 = vmatpush1.bf16.msra.mxu1 %v3124_v18 }
 0x67e   :  { %2586 = vmatprep.subr.bf16.mxu0 %v3128_v21  ;;  %2618 = vmatprep.subr.bf16.mxu1 %v3132_v24 }
 0x681   :  { %2588 = vmatpush1.bf16.msra.mxu0 %v3139_v28  ;;  %2620 = vmatpush1.bf16.msra.mxu1 %v3143_v33 }
 0x682   :  { %2590 = vmatprep.subr.bf16.mxu0 %v3147_v37  ;;  %2622 = vmatprep.subr.bf16.mxu1 %v3151_v41 }
 0x685   :  { %2592 = vmatpush1.bf16.msra.mxu0 %v3158_v46  ;;  %2624 = vmatpush1.bf16.msra.mxu1 %v3162_v50 }
 0x686   :  { %2594 = vmatprep.subr.bf16.mxu0 %v3166_v54  ;;  %2626 = vmatprep.subr.bf16.mxu1 %v3170_v59 }
 0x689   :  { %2596 = vmatpush1.bf16.msra.mxu0 %v3177_v1  ;;  %2628 = vmatpush1.bf16.msra.mxu1 %v3181_v6 }
 0x68a   :  { %2598 = vmatprep.subr.bf16.mxu0 %v3185_v10  ;;  %2630 = vmatprep.subr.bf16.mxu1 %v3189_v14  ;;  %v1887_v10 = vld [vmem:[#allocation8] sm:$0xff]  ;;  %v1888_v14 = vld [vmem:[#allocation8 + $0x8] sm:$0xff] }
 0x68d   :  { %2600 = vmatpush1.bf16.msra.mxu0 %v3196_v17  ;;  %2632 = vmatpush1.bf16.msra.mxu1 %v3200_v19  ;;  %v2634_v17 = vpack.c.bf16 %v1888_v14, %v1887_v10  ;;  %v2964_v19 = vmov 0.0|0.0  }
 0x68e   :  { %2633 = vmatprep.subr.bf16.mxu0 %v2964_v19 }
 0x743   :  { %v1606_v36 = vpop.f32.mrb[12].mxu0  ;;  %v1677_v39 = vpop.f32.mrb[12].mxu1 }
 0x744   :  { %v2669_v43 = vadd.f32 %v1606_v36, %v3252_v27  ;;  %v1608_v48 = vpop.f32.mrb[13].mxu0  ;;  %v1679_v51 = vpop.f32.mrb[13].mxu1  ;;  %v2685_v8 = vadd.f32 %v1677_v39, %v3261_v56 }
 0x745   :  { %v2670_v55 = vadd.f32 %v1608_v48, %v3254_v29  ;;  %v2686_v2 = vadd.f32 %v1679_v51, %v3258_v49 }
 0x746   :  { %v2042_v58 = vmul.f32 -1.442695, %v2669_v43 }
 0x747   :  { %v2043_v61 = vmul.f32 -1.442695, %v2670_v55  ;;  %v2044_v5 = vmul.f32 -1.442695, %v2686_v2 }
 0x748   :  { %2829 = vpow2.f32 %v2042_v58 }
 0x749   :  { %2831 = vpow2.f32 %v2043_v61 }
 0x74a   :  { %2833 = vpow2.f32 %v2044_v5 }
 0x74b   :  { %2835 = vtanh.f32 %v2685_v8 }
 0x752   :  { %v2830_v11 = vpop.eup %2829 }
 0x753   :  { %v2832_v15 = vpop.eup %2831  ;;  %v1692_v18 = vadd.f32 1.0, %v2830_v11 }
 0x754   :  { %v1693_v21 = vadd.f32 1.0, %v2832_v15  ;;  %v2834_v24 = vpop.eup %2833 }
 0x755   :  { %2837 = vrcp.f32 %v1692_v18  ;;  %v2836_v28 = vpop.eup %2835  ;;  %v1702_v46 = vadd.f32 1.0, %v2834_v24  ;;  %v2048_v18 = vld [vmem:[%s3543_s5] ss:$0 sm:$0xff] }
 0x756   :  { %2839 = vrcp.f32 %v1693_v21 }
 0x757   :  { %2841 = vrcp.f32 %v1702_v46 }
 0x75f   :  { %v2838_v33 = vpop.eup %2837 }
 0x760   :  { %v2840_v37 = vpop.eup %2839  ;;  %v1706_v41 = vmul.f32 %v2838_v33, %v2836_v28 }
 0x761   :  { %v1705_v50 = vmul.f32 %v2840_v37, %v3474_v7  ;;  %v2842_v59 = vpop.eup %2841 }
 0x763   :  { %v3514_v54 = vadd.f32 %v1706_v41, %v1705_v50 }
 0x765   :  { %2843 = vtanh.f32 %v3514_v54 }
 0x76f   :  { %v2844_v1 = vpop.eup %2843 }
 0x770   :  { %v1709_v6 = vmul.f32 %v2844_v1, %v2842_v59 }
 0x772   :  { %1782 = vmatmul.mubr.f32.vlgmr.msra.gmra.mrb[14].mxu0 %v1709_v6  ;;  %1853 = vmatmul.mubr.f32.vlgmr.msra.gmra.mrb[14].mxu1 %v1709_v6 }
 0x773   :  { %2635 = vmatpush3.bf16.msra.mxu0 %v2634_v17  ;;  %2098 = vmatprep.mubr.msk.f32.mxu0 %vm2965_vm4, %v2962_v0 }
 0x774   :  { %2636 = vmatprep.subr.bf16.mxu0 %v2964_v19 }
 0x777   :  { %2638 = vmatpush3.bf16.msra.mxu0 %v2637_v32 }
 0x778   :  { %2639 = vmatprep.subr.bf16.mxu0 %v2964_v19 }
 0x77b   :  { %2641 = vmatpush3.bf16.msra.mxu0 %v2640_v22 }
 0x77c   :  { %2642 = vmatprep.subr.bf16.mxu0 %v2964_v19 }
 0x77f   :  { %2644 = vmatpush3.bf16.msra.mxu0 %v2643_v35 }
 0x780   :  { %2645 = vmatprep.subr.bf16.mxu0 %v2964_v19 }
 0x783   :  { %2647 = vmatpush3.bf16.msra.mxu0 %v2646_v42 }
 0x784   :  { %2648 = vmatprep.subr.bf16.mxu0 %v2964_v19 }
 0x787   :  { %2650 = vmatpush3.bf16.msra.mxu0 %v2649_v47 }
 0x788   :  { %2651 = vmatprep.subr.bf16.mxu0 %v2964_v19 }
 0x78b   :  { %2653 = vmatpush3.bf16.msra.mxu0 %v2652_v52 }
 0x78c   :  { %2654 = vmatprep.subr.bf16.mxu0 %v2964_v19 }
 0x78f   :  { %2656 = vmatpush3.bf16.msra.mxu0 %v2655_v60 }
 0x845   :  { %v1783_v62 = vpop.f32.mrb[14].mxu0  ;;  %v1854_v63 = vpop.f32.mrb[14].mxu1 }
 0x846   :  { %v2671_v3 = vadd.f32 %v1783_v62, %v3252_v27  ;;  %v1785_v4 = vpop.f32.mrb[15].mxu0  ;;  %v1856_v7 = vpop.f32.mrb[15].mxu1  ;;  %v2687_v39 = vadd.f32 %v1854_v63, %v3261_v56 }
 0x847   :  { %v2672_v9 = vadd.f32 %v1785_v4, %v3254_v29  ;;  %v2688_v0 = vadd.f32 %v1856_v7, %v3258_v49 }
 0x848   :  { %v2045_v12 = vmul.f32 -1.442695, %v2671_v3 }
 0x849   :  { %v2046_v25 = vmul.f32 -1.442695, %v2672_v9  ;;  %v2047_v36 = vmul.f32 -1.442695, %v2688_v0 }
 0x84a   :  { %2845 = vpow2.f32 %v2045_v12 }
 0x84b   :  { %2847 = vpow2.f32 %v2046_v25 }
 0x84c   :  { %2849 = vpow2.f32 %v2047_v36 }
 0x84d   :  { %2851 = vtanh.f32 %v2687_v39 }
 0x854   :  { %v2846_v43 = vpop.eup %2845 }
 0x855   :  { %v2848_v48 = vpop.eup %2847  ;;  %v1869_v51 = vadd.f32 1.0, %v2846_v43 }
 0x856   :  { %v1870_v55 = vadd.f32 1.0, %v2848_v48  ;;  %v2850_v27 = vpop.eup %2849 }
 0x857   :  { %2853 = vrcp.f32 %v1869_v51  ;;  %v2852_v58 = vpop.eup %2851  ;;  %v1879_v5 = vadd.f32 1.0, %v2850_v27 }
 0x858   :  { %2855 = vrcp.f32 %v1870_v55 }
 0x859   :  { %2857 = vrcp.f32 %v1879_v5 }
 0x861   :  { %v2854_v29 = vpop.eup %2853 }
 0x862   :  { %v2856_v61 = vpop.eup %2855  ;;  %v1883_v2 = vmul.f32 %v2854_v29, %v2852_v58 }
 0x863   :  { %v1882_v8 = vmul.f32 %v2856_v61, %v3514_v54  ;;  %v2858_v56 = vpop.eup %2857 }
 0x865   :  { %v1884_v49 = vadd.f32 %v1883_v2, %v1882_v8 }
 0x867   :  { %2859 = vtanh.f32 %v1884_v49 }
 0x871   :  { %v2860_v11 = vpop.eup %2859 }
 0x872   :  { %v1886_v15 = vmul.f32 %v2860_v11, %v2858_v56 }
 0x874   :  { %2099 = vmatmul.mubr.f32.vlgmr.msra.gmra.mrb[16].mxu0 %v1886_v15 }
 0x947   :  { %v1976_v21 = vpop.f32.mrb[16].mxu0 }
 0x948   :  { %v1977_v24 = vadd.f32 %v2048_v18, %v1976_v21  ;;  %v2100_v28 = vpop.f32.mrb[17].mxu0 }
 0x94a   :  { %1980 = vst [vmem:[#allocation9] sm:$0xff] %v1977_v24 }
 0x94b   :  { %2938 = shalt.err (!%p2935_p0)
}
 0x94c   :  { %s2939_s1 = scalar_lea.hbm %s3544_s6, 128 }
 0x94d   :  { %p2940_p1 = scmp.ne.s32.totalorder %s3544_s6, %s2939_s1  ;;  %p2943_p2 = scmp.lt.u32.totalorder %s2939_s1, %s3544_s6 }
 0x94f   :  { %p2945_p3 = pnand %p2943_p2, %p2940_p1 }
 0x951   :  { %2948 = shalt.err (!%p2945_p3)
}
 0x952   :  { %1990 = dma.vmem_to_hbm [thread:$0]  %s1988_s29, 128, %s3544_s6, [#allocation5]  }
 0x953   :  { %2953 = dma.done.wait [#allocation5], 128  }
 0x954   :  { %2954 = vsyncadd [#allocation5], 4294967168 }
 0x955   :  { %1994 = vsyncpa [#allocation4], 1 }
 0x956   :  { %1995 = vsyncpa [#allocation7], 1 }
 0x957   :  { %1996 = vsyncpa [#allocation5], 1 }

</bundles_post_ra>
